<compile_context>
chip_gen: v5e
topology: v5e:2x2
jax: 0.10.0
libtpu: 0.0.40
codegen_flags: <defaults>
</compile_context>

<pallas_src>
import functools

import jax
import jax.numpy as jnp
from jax.experimental import pallas as pl
from jax.experimental.pallas import tpu as pltpu


def _round_up(v, m):
    return (v + m - 1) // m * m


def _dattn_kernel(x_ref, w_emb_ref, b_emb_ref, w_a1_ref, b_a1_ref,
                  w_a2_ref, w_head_ref, b_head_ref, out_ref,
                  m_ref, l_ref, acc_ref, *, n_valid):
    step = pl.program_id(0)
    nsteps = pl.num_programs(0)
    tn = x_ref.shape[0]

    @pl.when(step == 0)
    def _():
        m_ref[...] = jnp.full((1, 1), -1e30, jnp.float32)
        l_ref[...] = jnp.zeros((1, 1), jnp.float32)
        acc_ref[...] = jnp.zeros_like(acc_ref)

    # validity mask for the (possibly partial) last row tile
    row = step * tn + jax.lax.broadcasted_iota(jnp.int32, (tn, 1), 0)
    valid = row < n_valid                                        # (tn, 1)

    # ---- embedding: Linear(in_size, 512) + ReLU (bf16 MXU, f32 accum) ----
    # x streams in its native HBM dtype; cast to bf16 in-kernel (no wrapper
    # pad/cast pass over HBM).
    x = x_ref[...]
    if x.dtype != jnp.bfloat16:
        x = x.astype(jnp.bfloat16)
    h = jnp.dot(x, w_emb_ref[...], preferred_element_type=jnp.float32)
    h = jnp.maximum(h + b_emb_ref[...], 0.0)                     # (tn, 512) f32
    # Zero garbage rows of the partial last tile (guards e*h against 0*NaN)
    # and keep a single bf16 copy reused by both the scorer and the pooling.
    hb = jnp.where(valid, h, 0.0).astype(jnp.bfloat16)           # (tn, 512) bf16

    # ---- attention scorer: Linear(512,128) -> Tanh -> Linear(128,1) ----
    a1 = jnp.dot(hb, w_a1_ref[...], preferred_element_type=jnp.float32)
    a1 = jnp.tanh(a1 + b_a1_ref[...])                            # (tn, 128) f32
    # K == 1: second linear collapses to a per-row dot product.
    # (b_a2 is omitted: a constant logit offset cancels exactly under softmax.)
    logits = jnp.sum(a1 * w_a2_ref[...], axis=1, keepdims=True)  # (tn, 1)
    logits = jnp.where(valid, logits, -1e30)

    # ---- online softmax + attention pooling (running m, l, acc) ----
    m_old = m_ref[...]                                           # (1, 1)
    m_new = jnp.maximum(m_old, jnp.max(logits, axis=0, keepdims=True))
    alpha = jnp.exp(m_old - m_new)                               # rescale old state
    e = jnp.where(valid, jnp.exp(logits - m_new), 0.0)           # (tn, 1) f32
    l_ref[...] = alpha * l_ref[...] + jnp.sum(e, axis=0, keepdims=True)
    acc_ref[...] = alpha * acc_ref[...] + jnp.sum(e * hb, axis=0, keepdims=True)
    m_ref[...] = m_new

    # ---- final step: normalize + head Linear(512, out_dim) ----
    @pl.when(step == nsteps - 1)
    def _():
        pooled = acc_ref[...] * pl.reciprocal(l_ref[...], approx=True)  # (1,512)
        out = jnp.dot(pooled.astype(jnp.bfloat16), w_head_ref[...],
                      preferred_element_type=jnp.float32) + b_head_ref[...]
        out_ref[...] = out.astype(out_ref.dtype)


def dattention_forward(x, params, *, tn_max=2048):
    """x: (N, in_size) bag of instances. Returns (1, out_dim) float32."""
    if x.ndim == 1:        # guard: PyTorch x.squeeze() on an N==1 bag
        x = x[None, :]
    n, in_size = x.shape
    L = params["w_emb"].shape[1]          # 512
    D = params["w_a1"].shape[1]           # 128
    out_dim = params["w_head"].shape[1]

    # Row tile: multiple of 16 (sublane packing for the bf16 h copy), capped
    # at tn_max=2048: ~16 MiB of double-buffered f32 x tiles + ~1.3 MiB of
    # resident weights + activation temps stays well under the 48 MiB limit
    # on every generation (v7x included).
    tn = min(tn_max, _round_up(n, 16))
    grid = (pl.cdiv(n, tn),)              # partial last tile is masked in-kernel

    # lane-dense (padded to 128) head so the single output store is unmasked
    out_pad = _round_up(out_dim, 128)

    bf = jnp.bfloat16
    w_head_p = jnp.zeros((L, out_pad), bf).at[:, :out_dim].set(
        params["w_head"].astype(bf))
    b_head_p = jnp.zeros((1, out_pad), jnp.float32).at[:, :out_dim].set(
        params["b_head"])

    args = (x,                                             # streamed, no copy
            params["w_emb"].astype(bf), params["b_emb"],
            params["w_a1"].astype(bf), params["b_a1"],
            params["w_a2"],
            w_head_p, b_head_p)

    const = lambda i: (0, 0)       # weights/biases: VMEM-resident across tiles
    resident = pl.Buffered(1)      # DMA'd once -> single buffer saves VMEM
    in_specs = [
        pl.BlockSpec((tn, in_size), lambda i: (i, 0)),                # x tiles
        pl.BlockSpec((in_size, L), const, pipeline_mode=resident),    # w_emb
        pl.BlockSpec((1, L), const, pipeline_mode=resident),          # b_emb
        pl.BlockSpec((L, D), const, pipeline_mode=resident),          # w_a1
        pl.BlockSpec((1, D), const, pipeline_mode=resident),          # b_a1
        pl.BlockSpec((1, D), const, pipeline_mode=resident),          # w_a2
        pl.BlockSpec((L, out_pad), const, pipeline_mode=resident),    # w_head
        pl.BlockSpec((1, out_pad), const, pipeline_mode=resident),    # b_head
    ]

    flops = 2 * n * (in_size * L + L * D + D) + 2 * L * out_pad
    bytes_accessed = (n * in_size * x.dtype.itemsize
                      + (in_size * L + L * D + D + L * out_pad) * 2
                      + (L + D + out_pad) * 4
                      + out_pad * 4)

    out = pl.pallas_call(
        functools.partial(_dattn_kernel, n_valid=n),
        grid=grid,
        in_specs=in_specs,
        out_specs=pl.BlockSpec((1, out_pad), const),
        out_shape=jax.ShapeDtypeStruct((1, out_pad), jnp.float32),
        scratch_shapes=[pltpu.VMEM((1, 1), jnp.float32),   # running max  m
                        pltpu.VMEM((1, 1), jnp.float32),   # running sum  l
                        pltpu.VMEM((1, L), jnp.float32)],  # running acc  (1,512)
        compiler_params=pltpu.CompilerParams(
            dimension_semantics=("arbitrary",),            # reduction over tiles
            vmem_limit_bytes=48 * 1024 * 1024),
        cost_estimate=pl.CostEstimate(
            flops=flops,
            transcendentals=n * (D + 1),
            bytes_accessed=bytes_accessed),
    )(*args)
    return out[:, :out_dim]


def xavier_normal(key, fan_out, fan_in):
    # matches nn.init.xavier_normal_ on a (fan_out, fan_in) PyTorch weight
    std = (2.0 / (fan_in + fan_out)) ** 0.5
    return std * jax.random.normal(key, (fan_out, fan_in), dtype=jnp.float32)


def make_params(key, in_size=1024, out_dim=2):
    L, D = 512, 128
    k_emb, k_a1, k_a2, k_head = jax.random.split(key, 4)
    # weights stored transposed to (in, out) for the kernel; biases zero
    return {
        "w_emb": xavier_normal(k_emb, L, in_size).T,          # (in_size, 512)
        "b_emb": jnp.zeros((1, L), jnp.float32),
        "w_a1": xavier_normal(k_a1, D, L).T,                   # (512, 128)
        "b_a1": jnp.zeros((1, D), jnp.float32),
        "w_a2": xavier_normal(k_a2, 1, D),                     # (1, 128) row
        "b_a2": jnp.zeros((1, 1), jnp.float32),                # cancels in softmax
        "w_head": xavier_normal(k_head, out_dim, L).T,         # (512, out_dim)
        "b_head": jnp.zeros((1, out_dim), jnp.float32),
    }


def reference_forward(x, p):
    # pure-JAX reference mirroring the PyTorch forward (eval mode), with the
    # same bf16-operand / f32-accumulation matmul precision as the kernel.
    bf = jnp.bfloat16
    h = jax.nn.relu(jnp.dot(x.astype(bf), p["w_emb"].astype(bf),
                            preferred_element_type=jnp.float32) + p["b_emb"])
    a1 = jnp.tanh(jnp.dot(h.astype(bf), p["w_a1"].astype(bf),
                          preferred_element_type=jnp.float32) + p["b_a1"])
    logits = jnp.sum(a1 * p["w_a2"], axis=1, keepdims=True) + p["b_a2"]  # (N,1)
    attn = jax.nn.softmax(logits.T, axis=1)                              # (1,N)
    pooled = attn @ h                                                    # (1,512)
    return jnp.dot(pooled.astype(bf), p["w_head"].astype(bf),
                   preferred_element_type=jnp.float32) + p["b_head"]


if __name__ == "__main__":
    key = jax.random.PRNGKey(0)
    k_param, k_x = jax.random.split(key)

    N, in_size, out_dim = 16, 1024, 2
    params = make_params(k_param, in_size=in_size, out_dim=out_dim)

    # bag of N instances; module does x.squeeze() on a (1, N, in_size) input
    x_in = jax.random.normal(k_x, (1, N, in_size), dtype=jnp.float32)
    x = jnp.squeeze(x_in, axis=0)                              # (N, in_size)

    out = jax.block_until_ready(dattention_forward(x, params))
    ref = reference_forward(x, params)
    assert out.shape == (1, out_dim)
    assert jnp.allclose(out, ref, rtol=2e-2, atol=2e-2), (out, ref)

    # also exercise the multi-tile online-softmax path with a partial
    # (masked, non-padded) last tile: N2 = 300 with tn = 128
    N2 = 300
    x2 = jax.random.normal(jax.random.PRNGKey(1), (N2, in_size), jnp.float32)
    out2 = jax.block_until_ready(dattention_forward(x2, params, tn_max=128))
    ref2 = reference_forward(x2, params)
    assert jnp.allclose(out2, ref2, rtol=2e-2, atol=2e-2), (out2, ref2)

    print("KERNEL_OK")
</pallas_src>

<mosaic_0001>
module attributes {stable_mosaic.version = 11 : i64} {
  func.func @_dattn_kernel(%arg0: i32, %arg1: memref<16x1024xf32, #tpu.memory_space<vmem>>, %arg2: memref<1024x512xbf16, #tpu.memory_space<vmem>>, %arg3: memref<1x512xf32, #tpu.memory_space<vmem>>, %arg4: memref<512x128xbf16, #tpu.memory_space<vmem>>, %arg5: memref<1x128xf32, #tpu.memory_space<vmem>>, %arg6: memref<1x128xf32, #tpu.memory_space<vmem>>, %arg7: memref<512x128xbf16, #tpu.memory_space<vmem>>, %arg8: memref<1x128xf32, #tpu.memory_space<vmem>>, %arg9: memref<1x128xf32, #tpu.memory_space<vmem>>, %arg10: memref<1x1xf32, #tpu.memory_space<vmem>>, %arg11: memref<1x1xf32, #tpu.memory_space<vmem>>, %arg12: memref<1x512xf32, #tpu.memory_space<vmem>>) attributes {dimension_semantics = [#tpu.dimension_semantics<arbitrary>], iteration_bounds = array<i64: 1>, scalar_prefetch = 0 : i64, scratch_operands = 3 : i64, tpu.core_type = #tpu.core_type<tc>, window_params = [{transform_indices = @transform_0, window_bounds = array<i64: 16, 1024>}, {pipeline_mode = #tpu.pipeline_mode<synchronous>, transform_indices = @transform_1, window_bounds = array<i64: 1024, 512>}, {pipeline_mode = #tpu.pipeline_mode<synchronous>, transform_indices = @transform_2, window_bounds = array<i64: 1, 512>}, {pipeline_mode = #tpu.pipeline_mode<synchronous>, transform_indices = @transform_3, window_bounds = array<i64: 512, 128>}, {pipeline_mode = #tpu.pipeline_mode<synchronous>, transform_indices = @transform_4, window_bounds = array<i64: 1, 128>}, {pipeline_mode = #tpu.pipeline_mode<synchronous>, transform_indices = @transform_5, window_bounds = array<i64: 1, 128>}, {pipeline_mode = #tpu.pipeline_mode<synchronous>, transform_indices = @transform_6, window_bounds = array<i64: 512, 128>}, {pipeline_mode = #tpu.pipeline_mode<synchronous>, transform_indices = @transform_7, window_bounds = array<i64: 1, 128>}, {pipeline_mode = #tpu.pipeline_mode<synchronous>, transform_indices = @transform_8, window_bounds = array<i64: 1, 128>}]} {
    %c0_i32 = arith.constant 0 : i32
    %0 = arith.cmpi eq, %arg0, %c0_i32 : i32
    %1 = arith.extui %0 : i1 to i32
    %c0_i32_0 = arith.constant 0 : i32
    %2 = arith.cmpi ne, %1, %c0_i32_0 : i32
    scf.if %2 {
      %cst_36 = arith.constant -1.000000e+30 : f32
      %67 = vector.broadcast %cst_36 : f32 to vector<1x1xf32>
      %c0_37 = arith.constant 0 : index
      %c0_38 = arith.constant 0 : index
      %68 = vector.load %arg10[%c0_37, %c0_38] : memref<1x1xf32, #tpu.memory_space<vmem>>, vector<1x1xf32>
      tpu.vector_store %arg10[%c0_37, %c0_38], %67 {strides = array<i32>} : memref<1x1xf32, #tpu.memory_space<vmem>>, vector<1x1xf32>,
      %cst_39 = arith.constant 0.000000e+00 : f32
      %69 = vector.broadcast %cst_39 : f32 to vector<1x1xf32>
      %c0_40 = arith.constant 0 : index
      %c0_41 = arith.constant 0 : index
      %70 = vector.load %arg11[%c0_40, %c0_41] : memref<1x1xf32, #tpu.memory_space<vmem>>, vector<1x1xf32>
      tpu.vector_store %arg11[%c0_40, %c0_41], %69 {strides = array<i32>} : memref<1x1xf32, #tpu.memory_space<vmem>>, vector<1x1xf32>,
      %cst_42 = arith.constant 0.000000e+00 : f32
      %71 = vector.broadcast %cst_42 : f32 to vector<1x512xf32>
      %c0_43 = arith.constant 0 : index
      %c0_44 = arith.constant 0 : index
      %72 = vector.load %arg12[%c0_43, %c0_44] : memref<1x512xf32, #tpu.memory_space<vmem>>, vector<1x512xf32>
      tpu.vector_store %arg12[%c0_43, %c0_44], %71 {strides = array<i32>} : memref<1x512xf32, #tpu.memory_space<vmem>>, vector<1x512xf32>,
    } else {
    }
    %c16_i32 = arith.constant 16 : i32
    %3 = arith.muli %arg0, %c16_i32 : i32
    %4 = tpu.iota {dimensions = array<i32: 0>} : vector<16x1xi32>
    %5 = vector.broadcast %3 : i32 to vector<16x1xi32>
    %6 = arith.addi %5, %4 : vector<16x1xi32>
    %c16_i32_1 = arith.constant 16 : i32
    %7 = vector.broadcast %c16_i32_1 : i32 to vector<16x1xi32>
    %8 = arith.cmpi slt, %6, %7 : vector<16x1xi32>
    %c0 = arith.constant 0 : index
    %c0_2 = arith.constant 0 : index
    %9 = vector.load %arg1[%c0, %c0_2] : memref<16x1024xf32, #tpu.memory_space<vmem>>, vector<16x1024xf32>
    %10 = arith.truncf %9 : vector<16x1024xf32> to vector<16x1024xbf16>
    %c0_3 = arith.constant 0 : index
    %c0_4 = arith.constant 0 : index
    %11 = vector.load %arg2[%c0_3, %c0_4] : memref<1024x512xbf16, #tpu.memory_space<vmem>>, vector<1024x512xbf16>
    %cst = arith.constant dense<0.000000e+00> : vector<16x512xf32>
    %12 = tpu.matmul %10, %11, %cst {dimension_numbers = #tpu.dot_dimension_numbers<[1], [0], [0], [1], [0, 0, 1, 1], [], []>} : vector<16x1024xbf16>, vector<1024x512xbf16>, vector<16x512xf32> -> vector<16x512xf32>
    %c0_5 = arith.constant 0 : index
    %c0_6 = arith.constant 0 : index
    %13 = vector.load %arg3[%c0_5, %c0_6] : memref<1x512xf32, #tpu.memory_space<vmem>>, vector<1x512xf32>
    %14 = vector.broadcast %13 : vector<1x512xf32> to vector<16x512xf32>
    %15 = arith.addf %12, %14 : vector<16x512xf32>
    %cst_7 = arith.constant 0.000000e+00 : f32
    %16 = vector.broadcast %cst_7 : f32 to vector<16x512xf32>
    %17 = arith.maximumf %15, %16 : vector<16x512xf32>
    %cst_8 = arith.constant 0.000000e+00 : f32
    %18 = vector.shape_cast %8 : vector<16x1xi1> to vector<16x1xi1>
    %19 = vector.broadcast %18 : vector<16x1xi1> to vector<16x512xi1>
    %20 = vector.broadcast %cst_8 : f32 to vector<16x512xf32>
    %21 = arith.select %19, %17, %20 : vector<16x512xi1>, vector<16x512xf32>
    %22 = arith.truncf %21 : vector<16x512xf32> to vector<16x512xbf16>
    %c0_9 = arith.constant 0 : index
    %c0_10 = arith.constant 0 : index
    %23 = vector.load %arg4[%c0_9, %c0_10] : memref<512x128xbf16, #tpu.memory_space<vmem>>, vector<512x128xbf16>
    %cst_11 = arith.constant dense<0.000000e+00> : vector<16x128xf32>
    %24 = tpu.matmul %22, %23, %cst_11 {dimension_numbers = #tpu.dot_dimension_numbers<[1], [0], [0], [1], [0, 0, 1, 1], [], []>} : vector<16x512xbf16>, vector<512x128xbf16>, vector<16x128xf32> -> vector<16x128xf32>
    %c0_12 = arith.constant 0 : index
    %c0_13 = arith.constant 0 : index
    %25 = vector.load %arg5[%c0_12, %c0_13] : memref<1x128xf32, #tpu.memory_space<vmem>>, vector<1x128xf32>
    %26 = vector.broadcast %25 : vector<1x128xf32> to vector<16x128xf32>
    %27 = arith.addf %24, %26 : vector<16x128xf32>
    %28 = math.tanh %27 : vector<16x128xf32>
    %c0_14 = arith.constant 0 : index
    %c0_15 = arith.constant 0 : index
    %29 = vector.load %arg6[%c0_14, %c0_15] : memref<1x128xf32, #tpu.memory_space<vmem>>, vector<1x128xf32>
    %30 = vector.broadcast %29 : vector<1x128xf32> to vector<16x128xf32>
    %31 = arith.mulf %28, %30 : vector<16x128xf32>
    %cst_16 = arith.constant dense<0.000000e+00> : vector<16xf32>
    %32 = vector.multi_reduction <add>, %31, %cst_16 [1] : vector<16x128xf32> to vector<16xf32>
    %33 = vector.shape_cast %32 : vector<16xf32> to vector<16x1xf32>
    %cst_17 = arith.constant -1.000000e+30 : f32
    %34 = vector.broadcast %cst_17 : f32 to vector<16x1xf32>
    %35 = arith.select %8, %33, %34 : vector<16x1xi1>, vector<16x1xf32>
    %c0_18 = arith.constant 0 : index
    %c0_19 = arith.constant 0 : index
    %36 = vector.load %arg10[%c0_18, %c0_19] : memref<1x1xf32, #tpu.memory_space<vmem>>, vector<1x1xf32>
    %cst_20 = arith.constant dense<0xFF800000> : vector<1xf32>
    %37 = vector.multi_reduction <maximumf>, %35, %cst_20 [0] : vector<16x1xf32> to vector<1xf32>
    %38 = vector.shape_cast %37 : vector<1xf32> to vector<1x1xf32>
    %39 = arith.maximumf %36, %38 : vector<1x1xf32>
    %40 = arith.subf %36, %39 : vector<1x1xf32>
    %41 = math.exp %40 : vector<1x1xf32>
    %42 = vector.broadcast %39 : vector<1x1xf32> to vector<16x1xf32>
    %43 = arith.subf %35, %42 : vector<16x1xf32>
    %44 = math.exp %43 : vector<16x1xf32>
    %cst_21 = arith.constant 0.000000e+00 : f32
    %45 = vector.broadcast %cst_21 : f32 to vector<16x1xf32>
    %46 = arith.select %8, %44, %45 : vector<16x1xi1>, vector<16x1xf32>
    %c0_22 = arith.constant 0 : index
    %c0_23 = arith.constant 0 : index
    %47 = vector.load %arg11[%c0_22, %c0_23] : memref<1x1xf32, #tpu.memory_space<vmem>>, vector<1x1xf32>
    %48 = arith.mulf %41, %47 : vector<1x1xf32>
    %cst_24 = arith.constant dense<0.000000e+00> : vector<1xf32>
    %49 = vector.multi_reduction <add>, %46, %cst_24 [0] : vector<16x1xf32> to vector<1xf32>
    %50 = vector.shape_cast %49 : vector<1xf32> to vector<1x1xf32>
    %51 = arith.addf %48, %50 : vector<1x1xf32>
    %c0_25 = arith.constant 0 : index
    %c0_26 = arith.constant 0 : index
    %52 = vector.load %arg11[%c0_25, %c0_26] : memref<1x1xf32, #tpu.memory_space<vmem>>, vector<1x1xf32>
    tpu.vector_store %arg11[%c0_25, %c0_26], %51 {strides = array<i32>} : memref<1x1xf32, #tpu.memory_space<vmem>>, vector<1x1xf32>,
    %c0_27 = arith.constant 0 : index
    %c0_28 = arith.constant 0 : index
    %53 = vector.load %arg12[%c0_27, %c0_28] : memref<1x512xf32, #tpu.memory_space<vmem>>, vector<1x512xf32>
    %54 = vector.broadcast %41 : vector<1x1xf32> to vector<1x512xf32>
    %55 = arith.mulf %54, %53 : vector<1x512xf32>
    %56 = arith.extf %22 : vector<16x512xbf16> to vector<16x512xf32>
    %57 = vector.broadcast %46 : vector<16x1xf32> to vector<16x512xf32>
    %58 = arith.mulf %57, %56 : vector<16x512xf32>
    %cst_29 = arith.constant dense<0.000000e+00> : vector<512xf32>
    %59 = vector.multi_reduction <add>, %58, %cst_29 [0] : vector<16x512xf32> to vector<512xf32>
    %60 = vector.shape_cast %59 : vector<512xf32> to vector<1x512xf32>
    %61 = arith.addf %55, %60 : vector<1x512xf32>
    %c0_30 = arith.constant 0 : index
    %c0_31 = arith.constant 0 : index
    %62 = vector.load %arg12[%c0_30, %c0_31] : memref<1x512xf32, #tpu.memory_space<vmem>>, vector<1x512xf32>
    tpu.vector_store %arg12[%c0_30, %c0_31], %61 {strides = array<i32>} : memref<1x512xf32, #tpu.memory_space<vmem>>, vector<1x512xf32>,
    %c0_32 = arith.constant 0 : index
    %c0_33 = arith.constant 0 : index
    %63 = vector.load %arg10[%c0_32, %c0_33] : memref<1x1xf32, #tpu.memory_space<vmem>>, vector<1x1xf32>
    tpu.vector_store %arg10[%c0_32, %c0_33], %39 {strides = array<i32>} : memref<1x1xf32, #tpu.memory_space<vmem>>, vector<1x1xf32>,
    %c0_i32_34 = arith.constant 0 : i32
    %64 = arith.cmpi eq, %arg0, %c0_i32_34 : i32
    %65 = arith.extui %64 : i1 to i32
    %c0_i32_35 = arith.constant 0 : i32
    %66 = arith.cmpi ne, %65, %c0_i32_35 : i32
    scf.if %66 {
      %c0_36 = arith.constant 0 : index
      %c0_37 = arith.constant 0 : index
      %67 = vector.load %arg12[%c0_36, %c0_37] : memref<1x512xf32, #tpu.memory_space<vmem>>, vector<1x512xf32>
      %c0_38 = arith.constant 0 : index
      %c0_39 = arith.constant 0 : index
      %68 = vector.load %arg11[%c0_38, %c0_39] : memref<1x1xf32, #tpu.memory_space<vmem>>, vector<1x1xf32>
      %69 = tpu.reciprocal %68 {approx = true} : vector<1x1xf32> -> vector<1x1xf32>
      %70 = vector.broadcast %69 : vector<1x1xf32> to vector<1x512xf32>
      %71 = arith.mulf %67, %70 : vector<1x512xf32>
      %72 = arith.truncf %71 : vector<1x512xf32> to vector<1x512xbf16>
      %c0_40 = arith.constant 0 : index
      %c0_41 = arith.constant 0 : index
      %73 = vector.load %arg7[%c0_40, %c0_41] : memref<512x128xbf16, #tpu.memory_space<vmem>>, vector<512x128xbf16>
      %cst_42 = arith.constant dense<0.000000e+00> : vector<1x128xf32>
      %74 = tpu.matmul %72, %73, %cst_42 {dimension_numbers = #tpu.dot_dimension_numbers<[1], [0], [0], [1], [0, 0, 1, 1], [], []>} : vector<1x512xbf16>, vector<512x128xbf16>, vector<1x128xf32> -> vector<1x128xf32>
      %c0_43 = arith.constant 0 : index
      %c0_44 = arith.constant 0 : index
      %75 = vector.load %arg8[%c0_43, %c0_44] : memref<1x128xf32, #tpu.memory_space<vmem>>, vector<1x128xf32>
      %76 = arith.addf %74, %75 : vector<1x128xf32>
      %c0_45 = arith.constant 0 : index
      %c0_46 = arith.constant 0 : index
      %77 = vector.load %arg9[%c0_45, %c0_46] : memref<1x128xf32, #tpu.memory_space<vmem>>, vector<1x128xf32>
      tpu.vector_store %arg9[%c0_45, %c0_46], %76 {strides = array<i32>} : memref<1x128xf32, #tpu.memory_space<vmem>>, vector<1x128xf32>,
    } else {
    }
    return
  }
  func.func @transform_0(%arg0: i32) -> (i32, i32) {
    %c0_i32 = arith.constant 0 : i32
    %c0_i32_0 = arith.constant 0 : i32
    return %arg0, %c0_i32 : i32, i32
  }
  func.func @transform_1(%arg0: i32) -> (i32, i32) {
    %c0_i32 = arith.constant 0 : i32
    %c0_i32_0 = arith.constant 0 : i32
    %c0_i32_1 = arith.constant 0 : i32
    return %c0_i32, %c0_i32_0 : i32, i32
  }
  func.func @transform_2(%arg0: i32) -> (i32, i32) {
    %c0_i32 = arith.constant 0 : i32
    %c0_i32_0 = arith.constant 0 : i32
    %c0_i32_1 = arith.constant 0 : i32
    return %c0_i32, %c0_i32_0 : i32, i32
  }
  func.func @transform_3(%arg0: i32) -> (i32, i32) {
    %c0_i32 = arith.constant 0 : i32
    %c0_i32_0 = arith.constant 0 : i32
    %c0_i32_1 = arith.constant 0 : i32
    return %c0_i32, %c0_i32_0 : i32, i32
  }
  func.func @transform_4(%arg0: i32) -> (i32, i32) {
    %c0_i32 = arith.constant 0 : i32
    %c0_i32_0 = arith.constant 0 : i32
    %c0_i32_1 = arith.constant 0 : i32
    return %c0_i32, %c0_i32_0 : i32, i32
  }
  func.func @transform_5(%arg0: i32) -> (i32, i32) {
    %c0_i32 = arith.constant 0 : i32
    %c0_i32_0 = arith.constant 0 : i32
    %c0_i32_1 = arith.constant 0 : i32
    return %c0_i32, %c0_i32_0 : i32, i32
  }
  func.func @transform_6(%arg0: i32) -> (i32, i32) {
    %c0_i32 = arith.constant 0 : i32
    %c0_i32_0 = arith.constant 0 : i32
    %c0_i32_1 = arith.constant 0 : i32
    return %c0_i32, %c0_i32_0 : i32, i32
  }
  func.func @transform_7(%arg0: i32) -> (i32, i32) {
    %c0_i32 = arith.constant 0 : i32
    %c0_i32_0 = arith.constant 0 : i32
    %c0_i32_1 = arith.constant 0 : i32
    return %c0_i32, %c0_i32_0 : i32, i32
  }
  func.func @transform_8(%arg0: i32) -> (i32, i32) {
    %c0_i32 = arith.constant 0 : i32
    %c0_i32_0 = arith.constant 0 : i32
    %c0_i32_1 = arith.constant 0 : i32
    return %c0_i32, %c0_i32_0 : i32, i32
  }
}

</mosaic_0001>

<bundles_post_ra>
// kernel: tpu_custom_call.1
= control target key start
LH: loop header
LB: loop body
LE: loop exit
PB: predicated region body
PF: predicated region fallthrough
CT: control target
= control target key end

     0   :  { %13 = vsyncpa [#allocation6], 0  ;;  %s5015_s0 = inlined_call_operand.hbm [shape: f32[16,1024], index: 0, kind: input, shape index: {}]   ;;  %s5016_s1 = inlined_call_operand.hbm [shape: bf16[1024,512], index: 1, kind: input, shape index: {}]   ;;  %s5017_s2 = inlined_call_operand.hbm [shape: f32[1,512], index: 2, kind: input, shape index: {}]   ;;  %s5018_s3 = inlined_call_operand.hbm [shape: bf16[512,128], index: 3, kind: input, shape index: {}]   ;;  %s5019_s4 = inlined_call_operand.vmem [shape: f32[1,128], index: 4, kind: input, shape index: {}]   ;;  %s5020_s5 = inlined_call_operand.vmem [shape: f32[1,128], index: 5, kind: input, shape index: {}]   ;;  %s5021_s6 = inlined_call_operand.hbm [shape: bf16[512,128], index: 6, kind: input, shape index: {}]   ;;  %s5022_s7 = inlined_call_operand.vmem [shape: f32[1,128], index: 7, kind: input, shape index: {}]   ;;  %s5023_s8 = inlined_call_operand.hbm [shape: f32[1,128], index: 8, kind: output, shape index: {}]  }
   0x1   :  { %14 = vsyncpa [#allocation9], 0 }
   0x2   :  { %15 = vsyncpa [#allocation12], 0  ;;  %s34_s29 = sshll.u32 %s5016_s1, 4  ;;  %s35_s29 = int_to_ptr.hbm [resolvable:$true] %s34_s29 }
   0x3   :  { %16 = vsyncpa [#allocation7], 0  ;;  %s4778_s30 = smov [#allocation8]   ;;  %s4779_s10 = smov 256  }
   0x4   :  { %s36_s9 = sshll.u32 %s4778_s30, 4  ;;  %s4780_s11 = smov 16   ;;  %s37_s9 = int_to_ptr.vmem [resolvable:$true] %s36_s9 }
   0x5   :  { %42 = dma.hbm_to_vmem [thread:$0]  %s35_s29, 32768, %s37_s9, [#allocation9], %s4779_s10, %s4779_s10, %s4780_s11  }
   0x6   :  { %s58_s14 = sshll.u32 %s5018_s3, 4  ;;  %s4781_s15 = smov [#allocation11]   ;;  %s59_s14 = int_to_ptr.hbm [resolvable:$true] %s58_s14 }
   0x7   :  { %s60_s16 = sshll.u32 %s4781_s15, 4  ;;  %s4782_s17 = smov 64   ;;  %s61_s16 = int_to_ptr.vmem [resolvable:$true] %s60_s16 }
   0x8   :  { %s4783_s18 = smov 4   ;;  %s21_s20 = sshll.u32 %s5015_s0, 4  ;;  %s22_s20 = int_to_ptr.hbm [resolvable:$true] %s21_s20 }
   0x9   :  { %66 = dma.hbm_to_vmem [thread:$0]  %s59_s14, 4096, %s61_s16, [#allocation12], %s4782_s17, %s4782_s17, %s4783_s18  }
   0xa   :  { %s4784_s21 = smov [#allocation5]   ;;  %s4785_s23 = smov 1024  }
   0xb   :  { %s23_s22 = sshll.u32 %s4784_s21, 4  ;;  %s48_s3 = sshll.u32 %s5017_s2, 4  ;;  %s24_s22 = int_to_ptr.vmem [resolvable:$true] %s23_s22  ;;  %s49_s3 = int_to_ptr.hbm [resolvable:$true] %s48_s3 }
   0xc   :  { %29 = dma.hbm_to_vmem [thread:$0]  %s22_s20, 2048, %s24_s22, [#allocation6], %s4785_s23, %s4785_s23, %s4782_s17  }
   0xd   :  { %s4786_s26 = smov [#allocation10]   ;;  %s75_s30 = sshll.u32 %s5021_s6, 4  ;;  %s76_s30 = int_to_ptr.hbm [resolvable:$true] %s75_s30 }
   0xe   :  { %s50_s27 = sshll.u32 %s4786_s26, 4  ;;  %s4787_s0 = smov [#allocation13]   ;;  %s51_s27 = int_to_ptr.vmem [resolvable:$true] %s50_s27 }
   0xf   :  { %53 = dma.hbm_to_vmem [thread:$0]  %s49_s3, 64, %s51_s27, [#allocation9]  }
  0x10   :  { %s77_s9 = sshll.u32 %s4787_s0, 4  ;;  %s78_s9 = int_to_ptr.vmem [resolvable:$true] %s77_s9 }
  0x11   :  { %83 = dma.hbm_to_vmem [thread:$0]  %s76_s30, 4096, %s78_s9, [#allocation12], %s4782_s17, %s4782_s17, %s4783_s18  }
  0x12   :  { %4770 = dma.done.wait [#allocation6], 2048  }
  0x13   :  { %4771 = vsyncadd [#allocation6], 4294965248 }
  0x14   :  { %4772 = dma.done.wait [#allocation9], 32832  }
  0x15   :  { %4773 = vsyncadd [#allocation9], 4294934464 }
  0x16   :  { %4774 = dma.done.wait [#allocation12], 8192  }
  0x17   :  { %4775 = vsyncadd [#allocation12], 4294959104  ;;  %v3109_v0 = vld [vmem:[#allocation8 + $0xe0] sm:$0xf]  ;;  %v4305_v1 = vld [vmem:[#allocation8 + $0xec] sm:$0xf0] }
  0x18   :  { %v3237_v2 = vld [vmem:[#allocation8 + $0x1e0] sm:$0xf]  ;;  %v3110_v3 = vor.u32 %v4305_v1, %v3109_v0  ;;  %v4337_v4 = vld [vmem:[#allocation8 + $0x1ec] sm:$0xf0]  ;;  %vm110_vm0 = vcmask 0   ;;  %vm2544_vm2 = vcmask 7168  }
  0x19   :  { %v3365_v5 = vld [vmem:[#allocation8 + $0x2e0] sm:$0xf]  ;;  %v4369_v6 = vld [vmem:[#allocation8 + $0x2ec] sm:$0xf0]  ;;  %v3238_v7 = vor.u32 %v4337_v4, %v3237_v2  ;;  %vm2626_vm3 = vcmask 1040384   ;;  %vm2628_vm4 = vcmask 1042434  }
  0x1a   :  { %v3366_v8 = vor.u32 %v4369_v6, %v3365_v5  ;;  %v3493_v9 = vld [vmem:[#allocation8 + $0x3e0] sm:$0xf]  ;;  %v4401_v10 = vld [vmem:[#allocation8 + $0x3ec] sm:$0xf0]  ;;  %1697 = vmatpush.bf16.msra.mxu0 %v3110_v3  ;;  %vm2630_vm5 = vcmask 1041408   ;;  %s4791_s12 = smov [#allocation14]  }
  0x1b   :  { %v3093_v11 = vld [vmem:[#allocation8 + $0xc0] sm:$0xf]  ;;  %v3494_v12 = vor.u32 %v4401_v10, %v3493_v9  ;;  %v4301_v13 = vld [vmem:[#allocation8 + $0xcc] sm:$0xf0]  ;;  %1711 = vmatpush.bf16.msra.mxu1 %v3238_v7  ;;  %s2981_s13 = sshll.u32 %s4791_s12, 4  ;;  %s2983_s16 = sshll.u32 %s5023_s8, 4  ;;  %s2982_s13 = int_to_ptr.vmem [resolvable:$true] %s2981_s13  ;;  %s2984_s16 = int_to_ptr.hbm [resolvable:$true] %s2983_s16 }
  0x1c   :  { %v3221_v14 = vld [vmem:[#allocation8 + $0x1c0] sm:$0xf]  ;;  %v4333_v15 = vld [vmem:[#allocation8 + $0x1cc] sm:$0xf0]  ;;  %1725 = vmatpush.bf16.msra.mxu2 %v3366_v8  ;;  %v3094_v16 = vor.u32 %v4301_v13, %v3093_v11 }
  0x1d   :  { %v3222_v17 = vor.u32 %v4333_v15, %v3221_v14  ;;  %v3349_v18 = vld [vmem:[#allocation8 + $0x2c0] sm:$0xf]  ;;  %v4365_v19 = vld [vmem:[#allocation8 + $0x2cc] sm:$0xf0]  ;;  %1739 = vmatpush.bf16.msra.mxu3 %v3494_v12 }
  0x1e   :  { %v3477_v20 = vld [vmem:[#allocation8 + $0x3c0] sm:$0xf]  ;;  %v3350_v21 = vor.u32 %v4365_v19, %v3349_v18  ;;  %v4397_v22 = vld [vmem:[#allocation8 + $0x3cc] sm:$0xf0]  ;;  %1698 = vmatpush.bf16.msra.mxu0 %v3094_v16 }
  0x1f   :  { %v3077_v23 = vld [vmem:[#allocation8 + $0xa0] sm:$0xf]  ;;  %v4297_v24 = vld [vmem:[#allocation8 + $0xac] sm:$0xf0]  ;;  %v3478_v25 = vor.u32 %v4397_v22, %v3477_v20  ;;  %1712 = vmatpush.bf16.msra.mxu1 %v3222_v17 }
  0x20   :  { %v3205_v26 = vld [vmem:[#allocation8 + $0x1a0] sm:$0xf]  ;;  %v4329_v27 = vld [vmem:[#allocation8 + $0x1ac] sm:$0xf0]  ;;  %v3078_v29 = vor.u32 %v4297_v24, %v3077_v23  ;;  %1726 = vmatpush.bf16.msra.mxu2 %v3350_v21 }
  0x21   :  { %v3333_v28 = vld [vmem:[#allocation8 + $0x2a0] sm:$0xf]  ;;  %v4361_v30 = vld [vmem:[#allocation8 + $0x2ac] sm:$0xf0]  ;;  %v3206_v33 = vor.u32 %v4329_v27, %v3205_v26  ;;  %1740 = vmatpush.bf16.msra.mxu3 %v3478_v25 }
  0x22   :  { %v3461_v31 = vld [vmem:[#allocation8 + $0x3a0] sm:$0xf]  ;;  %v4393_v32 = vld [vmem:[#allocation8 + $0x3ac] sm:$0xf0]  ;;  %v3334_v34 = vor.u32 %v4361_v30, %v3333_v28  ;;  %1699 = vmatpush.bf16.msra.mxu0 %v3078_v29 }
  0x23   :  { %v3061_v35 = vld [vmem:[#allocation8 + $0x80] sm:$0xf]  ;;  %v4293_v36 = vld [vmem:[#allocation8 + $0x8c] sm:$0xf0]  ;;  %v3462_v38 = vor.u32 %v4393_v32, %v3461_v31  ;;  %1713 = vmatpush.bf16.msra.mxu1 %v3206_v33 }
  0x24   :  { %v3189_v37 = vld [vmem:[#allocation8 + $0x180] sm:$0xf]  ;;  %v4325_v39 = vld [vmem:[#allocation8 + $0x18c] sm:$0xf0]  ;;  %v3062_v44 = vor.u32 %v4293_v36, %v3061_v35  ;;  %1727 = vmatpush.bf16.msra.mxu2 %v3334_v34 }
  0x25   :  { %v3317_v40 = vld [vmem:[#allocation8 + $0x280] sm:$0xf]  ;;  %v4357_v41 = vld [vmem:[#allocation8 + $0x28c] sm:$0xf0]  ;;  %v3190_v45 = vor.u32 %v4325_v39, %v3189_v37  ;;  %1741 = vmatpush.bf16.msra.mxu3 %v3462_v38 }
  0x26   :  { %v3445_v42 = vld [vmem:[#allocation8 + $0x380] sm:$0xf]  ;;  %v4389_v43 = vld [vmem:[#allocation8 + $0x38c] sm:$0xf0]  ;;  %v3318_v46 = vor.u32 %v4357_v41, %v3317_v40  ;;  %1700 = vmatpush.bf16.msra.mxu0 %v3062_v44 }
  0x27   :  { %v3045_v47 = vld [vmem:[#allocation8 + $0x60] sm:$0xf]  ;;  %v4289_v48 = vld [vmem:[#allocation8 + $0x6c] sm:$0xf0]  ;;  %v3446_v50 = vor.u32 %v4389_v43, %v3445_v42  ;;  %1714 = vmatpush.bf16.msra.mxu1 %v3190_v45 }
  0x28   :  { %v3173_v49 = vld [vmem:[#allocation8 + $0x160] sm:$0xf]  ;;  %v4321_v51 = vld [vmem:[#allocation8 + $0x16c] sm:$0xf0]  ;;  %v3046_v56 = vor.u32 %v4289_v48, %v3045_v47  ;;  %1728 = vmatpush.bf16.msra.mxu2 %v3318_v46 }
  0x29   :  { %v3301_v52 = vld [vmem:[#allocation8 + $0x260] sm:$0xf]  ;;  %v4353_v53 = vld [vmem:[#allocation8 + $0x26c] sm:$0xf0]  ;;  %v3174_v57 = vor.u32 %v4321_v51, %v3173_v49  ;;  %1742 = vmatpush.bf16.msra.mxu3 %v3446_v50 }
  0x2a   :  { %v3429_v54 = vld [vmem:[#allocation8 + $0x360] sm:$0xf]  ;;  %v4385_v55 = vld [vmem:[#allocation8 + $0x36c] sm:$0xf0]  ;;  %v3302_v58 = vor.u32 %v4353_v53, %v3301_v52  ;;  %1701 = vmatpush.bf16.msra.mxu0 %v3046_v56 }
  0x2b   :  { %v3029_v59 = vld [vmem:[#allocation8 + $0x40] sm:$0xf]  ;;  %v4285_v60 = vld [vmem:[#allocation8 + $0x4c] sm:$0xf0]  ;;  %v3430_v62 = vor.u32 %v4385_v55, %v3429_v54  ;;  %1715 = vmatpush.bf16.msra.mxu1 %v3174_v57 }
  0x2c   :  { %v3157_v61 = vld [vmem:[#allocation8 + $0x140] sm:$0xf]  ;;  %v4317_v63 = vld [vmem:[#allocation8 + $0x14c] sm:$0xf0]  ;;  %v3030_v4 = vor.u32 %v4285_v60, %v3029_v59  ;;  %1729 = vmatpush.bf16.msra.mxu2 %v3302_v58 }
  0x2d   :  { %v3285_v0 = vld [vmem:[#allocation8 + $0x240] sm:$0xf]  ;;  %v4349_v1 = vld [vmem:[#allocation8 + $0x24c] sm:$0xf0]  ;;  %v3158_v5 = vor.u32 %v4317_v63, %v3157_v61  ;;  %1743 = vmatpush.bf16.msra.mxu3 %v3430_v62 }
  0x2e   :  { %v3413_v2 = vld [vmem:[#allocation8 + $0x340] sm:$0xf]  ;;  %v4381_v3 = vld [vmem:[#allocation8 + $0x34c] sm:$0xf0]  ;;  %v3286_v6 = vor.u32 %v4349_v1, %v3285_v0  ;;  %1702 = vmatpush.bf16.msra.mxu0 %v3030_v4 }
  0x2f   :  { %v3013_v7 = vld [vmem:[#allocation8 + $0x20] sm:$0xf]  ;;  %v4281_v8 = vld [vmem:[#allocation8 + $0x2c] sm:$0xf0]  ;;  %v3414_v10 = vor.u32 %v4381_v3, %v3413_v2  ;;  %1716 = vmatpush.bf16.msra.mxu1 %v3158_v5 }
  0x30   :  { %v3141_v9 = vld [vmem:[#allocation8 + $0x120] sm:$0xf]  ;;  %v4313_v11 = vld [vmem:[#allocation8 + $0x12c] sm:$0xf0]  ;;  %v3014_v16 = vor.u32 %v4281_v8, %v3013_v7  ;;  %1730 = vmatpush.bf16.msra.mxu2 %v3286_v6  ;;  %v128_v6 = vld [vmem:[#allocation5 + $0x8] sm:$0xff] }
  0x31   :  { %v3269_v12 = vld [vmem:[#allocation8 + $0x220] sm:$0xf]  ;;  %v4345_v13 = vld [vmem:[#allocation8 + $0x22c] sm:$0xf0]  ;;  %v3142_v19 = vor.u32 %v4313_v11, %v3141_v9  ;;  %1744 = vmatpush.bf16.msra.mxu3 %v3414_v10  ;;  %v136_v7 = vld [vmem:[#allocation5 + $0x48] sm:$0xff] }
  0x32   :  { %v3397_v14 = vld [vmem:[#allocation8 + $0x320] sm:$0xf]  ;;  %v4377_v15 = vld [vmem:[#allocation8 + $0x32c] sm:$0xf0]  ;;  %v3270_v20 = vor.u32 %v4345_v13, %v3269_v12  ;;  %1703 = vmatpush.bf16.msra.mxu0 %v3014_v16  ;;  %v130_v8 = vld [vmem:[#allocation5 + $0x18] sm:$0xff]  ;;  %v4858_v10 = vpack.c.bf16 %v136_v7, %v128_v6 }
  0x33   :  { %v2997_v17 = vld [vmem:[#allocation8] sm:$0xf]  ;;  %v4277_v18 = vld [vmem:[#allocation8 + $0xc] sm:$0xf0]  ;;  %v3398_v24 = vor.u32 %v4377_v15, %v3397_v14  ;;  %1717 = vmatpush.bf16.msra.mxu1 %v3142_v19  ;;  %v138_v11 = vld [vmem:[#allocation5 + $0x58] sm:$0xff] }
  0x34   :  { %v3125_v21 = vld [vmem:[#allocation8 + $0x100] sm:$0xf]  ;;  %v4309_v22 = vld [vmem:[#allocation8 + $0x10c] sm:$0xf0]  ;;  %v2998_v31 = vor.u32 %v4277_v18, %v2997_v17  ;;  %1731 = vmatpush.bf16.msra.mxu2 %v3270_v20  ;;  %v4860_v17 = vpack.c.bf16 %v138_v11, %v130_v8 }
  0x35   :  { %v3253_v23 = vld [vmem:[#allocation8 + $0x200] sm:$0xf]  ;;  %v4341_v25 = vld [vmem:[#allocation8 + $0x20c] sm:$0xf0]  ;;  %v3126_v35 = vor.u32 %v4309_v22, %v3125_v21  ;;  %1745 = vmatpush.bf16.msra.mxu3 %v3398_v24 }
  0x36   :  { %v3381_v26 = vld [vmem:[#allocation8 + $0x300] sm:$0xf]  ;;  %v4373_v27 = vld [vmem:[#allocation8 + $0x30c] sm:$0xf0]  ;;  %v3254_v36 = vor.u32 %v4341_v25, %v3253_v23  ;;  %1704 = vmatpush.bf16.msra.mxu0 %v2998_v31 }
  0x37   :  { %v3621_v28 = vld [vmem:[#allocation8 + $0x4e0] sm:$0xf]  ;;  %v4433_v29 = vld [vmem:[#allocation8 + $0x4ec] sm:$0xf0]  ;;  %v3382_v39 = vor.u32 %v4373_v27, %v3381_v26  ;;  %1718 = vmatpush.bf16.msra.mxu1 %v3126_v35 }
  0x38   :  { %v3749_v30 = vld [vmem:[#allocation8 + $0x5e0] sm:$0xf]  ;;  %v4465_v32 = vld [vmem:[#allocation8 + $0x5ec] sm:$0xf0]  ;;  %v3622_v40 = vor.u32 %v4433_v29, %v3621_v28  ;;  %1732 = vmatpush.bf16.msra.mxu2 %v3254_v36 }
  0x39   :  { %v3877_v33 = vld [vmem:[#allocation8 + $0x6e0] sm:$0xf]  ;;  %v4497_v34 = vld [vmem:[#allocation8 + $0x6ec] sm:$0xf0]  ;;  %v3750_v43 = vor.u32 %v4465_v32, %v3749_v30  ;;  %1746 = vmatpush.bf16.msra.mxu3 %v3382_v39 }
  0x3a   :  { %v4005_v37 = vld [vmem:[#allocation8 + $0x7e0] sm:$0xf]  ;;  %v4529_v38 = vld [vmem:[#allocation8 + $0x7ec] sm:$0xf0]  ;;  %v3878_v44 = vor.u32 %v4497_v34, %v3877_v33  ;;  %1753 = vmatpush.bf16.msrb.mxu0 %v3622_v40  ;;  %1719 = vmatmul.bf16.vlgmr.msra.gmra.mxu1 %v4858_v10 }
  0x3b   :  { %v3605_v41 = vld [vmem:[#allocation8 + $0x4c0] sm:$0xf]  ;;  %v4429_v42 = vld [vmem:[#allocation8 + $0x4cc] sm:$0xf0]  ;;  %v4006_v48 = vor.u32 %v4529_v38, %v4005_v37  ;;  %1767 = vmatpush.bf16.msrb.mxu1 %v3750_v43 }
  0x3c   :  { %v3733_v45 = vld [vmem:[#allocation8 + $0x5c0] sm:$0xf]  ;;  %v4461_v46 = vld [vmem:[#allocation8 + $0x5cc] sm:$0xf0]  ;;  %v3606_v55 = vor.u32 %v4429_v42, %v3605_v41  ;;  %1781 = vmatpush.bf16.msrb.mxu2 %v3878_v44  ;;  %1747 = vmatmul.bf16.vlgmr.msra.gmra.mxu3 %v4860_v17 }
  0x3d   :  { %v3861_v47 = vld [vmem:[#allocation8 + $0x6c0] sm:$0xf]  ;;  %v4493_v49 = vld [vmem:[#allocation8 + $0x6cc] sm:$0xf0]  ;;  %v3734_v60 = vor.u32 %v4461_v46, %v3733_v45  ;;  %1795 = vmatpush.bf16.msrb.mxu3 %v4006_v48 }
  0x3e   :  { %v3989_v50 = vld [vmem:[#allocation8 + $0x7c0] sm:$0xf]  ;;  %v4525_v51 = vld [vmem:[#allocation8 + $0x7cc] sm:$0xf0]  ;;  %v3862_v61 = vor.u32 %v4493_v49, %v3861_v47  ;;  %1754 = vmatpush.bf16.msrb.mxu0 %v3606_v55 }
  0x3f   :  { %v127_v52 = vld [vmem:[#allocation5] sm:$0xff]  ;;  %v129_v54 = vld [vmem:[#allocation5 + $0x10] sm:$0xff]  ;;  %v3990_v2 = vor.u32 %v4525_v51, %v3989_v50  ;;  %1768 = vmatpush.bf16.msrb.mxu1 %v3734_v60 }
  0x40   :  { %v135_v53 = vld [vmem:[#allocation5 + $0x40] sm:$0xff]  ;;  %v4425_v57 = vld [vmem:[#allocation8 + $0x4ac] sm:$0xf0]  ;;  %1782 = vmatpush.bf16.msrb.mxu2 %v3862_v61 }
  0x41   :  { %v3589_v56 = vld [vmem:[#allocation8 + $0x4a0] sm:$0xf]  ;;  %v4852_v58 = vpack.c.bf16 %v135_v53, %v127_v52  ;;  %v137_v59 = vld [vmem:[#allocation5 + $0x50] sm:$0xff]  ;;  %1796 = vmatpush.bf16.msrb.mxu3 %v3990_v2 }
  0x42   :  { %v3717_v62 = vld [vmem:[#allocation8 + $0x5a0] sm:$0xf]  ;;  %v4457_v63 = vld [vmem:[#allocation8 + $0x5ac] sm:$0xf0]  ;;  %v4854_v1 = vpack.c.bf16 %v137_v59, %v129_v54  ;;  %v3590_v9 = vor.u32 %v4425_v57, %v3589_v56 }
  0x43   :  { %v3845_v0 = vld [vmem:[#allocation8 + $0x6a0] sm:$0xf]  ;;  %v4489_v3 = vld [vmem:[#allocation8 + $0x6ac] sm:$0xf0]  ;;  %1705 = vmatmul.bf16.vlgmr.msra.gmra.mxu0 %v4852_v58  ;;  %v3718_v12 = vor.u32 %v4457_v63, %v3717_v62 }
  0x44   :  { %v3973_v4 = vld [vmem:[#allocation8 + $0x7a0] sm:$0xf]  ;;  %v4521_v5 = vld [vmem:[#allocation8 + $0x7ac] sm:$0xf0]  ;;  %1733 = vmatmul.bf16.vlgmr.msra.gmra.mxu2 %v4854_v1  ;;  %v3846_v13 = vor.u32 %v4489_v3, %v3845_v0  ;;  %1755 = vmatpush.bf16.msrb.mxu0 %v3590_v9  ;;  %v4303_v9 = vld [vmem:[#allocation8 + $0xe4] sm:$0xf] }
  0x45   :  { %v3573_v14 = vld [vmem:[#allocation8 + $0x480] sm:$0xf]  ;;  %v4421_v15 = vld [vmem:[#allocation8 + $0x48c] sm:$0xf0]  ;;  %v3974_v18 = vor.u32 %v4521_v5, %v3973_v4  ;;  %1769 = vmatpush.bf16.msrb.mxu1 %v3718_v12  ;;  %v3111_v12 = vld [vmem:[#allocation8 + $0xf0] sm:$0xf0] }
  0x46   :  { %v3701_v16 = vld [vmem:[#allocation8 + $0x580] sm:$0xf]  ;;  %v4453_v19 = vld [vmem:[#allocation8 + $0x58c] sm:$0xf0]  ;;  %v3574_v24 = vor.u32 %v4421_v15, %v3573_v14  ;;  %1783 = vmatpush.bf16.msrb.mxu2 %v3846_v13  ;;  %v4335_v13 = vld [vmem:[#allocation8 + $0x1e4] sm:$0xf] }
  0x47   :  { %v3829_v20 = vld [vmem:[#allocation8 + $0x680] sm:$0xf]  ;;  %v4485_v21 = vld [vmem:[#allocation8 + $0x68c] sm:$0xf0]  ;;  %v3702_v25 = vor.u32 %v4453_v19, %v3701_v16  ;;  %1797 = vmatpush.bf16.msrb.mxu3 %v3974_v18  ;;  %v3239_v14 = vld [vmem:[#allocation8 + $0x1f0] sm:$0xf0] }
  0x48   :  { %v3957_v22 = vld [vmem:[#allocation8 + $0x780] sm:$0xf]  ;;  %v4517_v23 = vld [vmem:[#allocation8 + $0x78c] sm:$0xf0]  ;;  %v3830_v26 = vor.u32 %v4485_v21, %v3829_v20  ;;  %1756 = vmatpush.bf16.msrb.mxu0 %v3574_v24  ;;  %v4367_v15 = vld [vmem:[#allocation8 + $0x2e4] sm:$0xf] }
  0x49   :  { %v3557_v27 = vld [vmem:[#allocation8 + $0x460] sm:$0xf]  ;;  %v4417_v28 = vld [vmem:[#allocation8 + $0x46c] sm:$0xf0]  ;;  %v3958_v30 = vor.u32 %v4517_v23, %v3957_v22  ;;  %1770 = vmatpush.bf16.msrb.mxu1 %v3702_v25  ;;  %v3367_v16 = vld [vmem:[#allocation8 + $0x2f0] sm:$0xf0] }
  0x4a   :  { %v3685_v29 = vld [vmem:[#allocation8 + $0x560] sm:$0xf]  ;;  %v4449_v31 = vld [vmem:[#allocation8 + $0x56c] sm:$0xf0]  ;;  %v3558_v36 = vor.u32 %v4417_v28, %v3557_v27  ;;  %1784 = vmatpush.bf16.msrb.mxu2 %v3830_v26  ;;  %v4399_v18 = vld [vmem:[#allocation8 + $0x3e4] sm:$0xf] }
  0x4b   :  { %v3813_v32 = vld [vmem:[#allocation8 + $0x660] sm:$0xf]  ;;  %v4481_v33 = vld [vmem:[#allocation8 + $0x66c] sm:$0xf0]  ;;  %v3686_v37 = vor.u32 %v4449_v31, %v3685_v29  ;;  %1798 = vmatpush.bf16.msrb.mxu3 %v3958_v30  ;;  %v3495_v20 = vld [vmem:[#allocation8 + $0x3f0] sm:$0xf0]  ;;  %v3114_v29 = vor.u32 %v4303_v9, %v3111_v12 }
  0x4c   :  { %v3941_v34 = vld [vmem:[#allocation8 + $0x760] sm:$0xf]  ;;  %v4513_v35 = vld [vmem:[#allocation8 + $0x76c] sm:$0xf0]  ;;  %v3814_v38 = vor.u32 %v4481_v33, %v3813_v32  ;;  %1757 = vmatpush.bf16.msrb.mxu0 %v3558_v36  ;;  %v132_v27 = vld [vmem:[#allocation5 + $0x28] sm:$0xff]  ;;  %v3242_v33 = vor.u32 %v4335_v13, %v3239_v14 }
  0x4d   :  { %v3541_v39 = vld [vmem:[#allocation8 + $0x440] sm:$0xf]  ;;  %v4413_v40 = vld [vmem:[#allocation8 + $0x44c] sm:$0xf0]  ;;  %v3942_v42 = vor.u32 %v4513_v35, %v3941_v34  ;;  %1771 = vmatpush.bf16.msrb.mxu1 %v3686_v37  ;;  %v140_v30 = vld [vmem:[#allocation5 + $0x68] sm:$0xff]  ;;  %v3370_v34 = vor.u32 %v4367_v15, %v3367_v16 }
  0x4e   :  { %v3669_v41 = vld [vmem:[#allocation8 + $0x540] sm:$0xf]  ;;  %v4445_v43 = vld [vmem:[#allocation8 + $0x54c] sm:$0xf0]  ;;  %v3542_v48 = vor.u32 %v4413_v40, %v3541_v39  ;;  %1785 = vmatpush.bf16.msrb.mxu2 %v3814_v38  ;;  %v134_v31 = vld [vmem:[#allocation5 + $0x38] sm:$0xff]  ;;  %v3498_v38 = vor.u32 %v4399_v18, %v3495_v20 }
  0x4f   :  { %v3797_v44 = vld [vmem:[#allocation8 + $0x640] sm:$0xf]  ;;  %v4477_v45 = vld [vmem:[#allocation8 + $0x64c] sm:$0xf0]  ;;  %v3670_v50 = vor.u32 %v4445_v43, %v3669_v41  ;;  %1799 = vmatpush.bf16.msrb.mxu3 %v3942_v42  ;;  %v142_v32 = vld [vmem:[#allocation5 + $0x78] sm:$0xff] }
  0x50   :  { %v3925_v46 = vld [vmem:[#allocation8 + $0x740] sm:$0xf]  ;;  %v4509_v47 = vld [vmem:[#allocation8 + $0x74c] sm:$0xf0]  ;;  %v3798_v51 = vor.u32 %v4477_v45, %v3797_v44  ;;  %1758 = vmatpush.bf16.msrb.mxu0 %v3542_v48  ;;  %v4299_v35 = vld [vmem:[#allocation8 + $0xc4] sm:$0xf]  ;;  %v4868_v44 = vpack.c.bf16 %v140_v30, %v132_v27 }
  0x51   :  { %v3525_v49 = vld [vmem:[#allocation8 + $0x420] sm:$0xf]  ;;  %v4409_v52 = vld [vmem:[#allocation8 + $0x42c] sm:$0xf0]  ;;  %v3926_v55 = vor.u32 %v4509_v47, %v3925_v46  ;;  %1772 = vmatpush.bf16.msrb.mxu1 %v3670_v50  ;;  %v3095_v36 = vld [vmem:[#allocation8 + $0xd0] sm:$0xf0]  ;;  %v4870_v47 = vpack.c.bf16 %v142_v32, %v134_v31 }
  0x52   :  { %v3653_v53 = vld [vmem:[#allocation8 + $0x520] sm:$0xf]  ;;  %v4441_v54 = vld [vmem:[#allocation8 + $0x52c] sm:$0xf0]  ;;  %v3526_v63 = vor.u32 %v4409_v52, %v3525_v49  ;;  %1786 = vmatpush.bf16.msrb.mxu2 %v3798_v51  ;;  %v4331_v37 = vld [vmem:[#allocation8 + $0x1c4] sm:$0xf]  ;;  %v3098_v48 = vor.u32 %v4299_v35, %v3095_v36 }
  0x53   :  { %v3781_v56 = vld [vmem:[#allocation8 + $0x620] sm:$0xf]  ;;  %v4473_v57 = vld [vmem:[#allocation8 + $0x62c] sm:$0xf0]  ;;  %v3654_v5 = vor.u32 %v4441_v54, %v3653_v53  ;;  %1800 = vmatpush.bf16.msrb.mxu3 %v3926_v55  ;;  %v3223_v40 = vld [vmem:[#allocation8 + $0x1d0] sm:$0xf0] }
  0x54   :  { %v3909_v59 = vld [vmem:[#allocation8 + $0x720] sm:$0xf]  ;;  %v4505_v60 = vld [vmem:[#allocation8 + $0x72c] sm:$0xf0]  ;;  %v3782_v6 = vor.u32 %v4473_v57, %v3781_v56  ;;  %1759 = vmatpush.bf16.msrb.mxu0 %v3526_v63  ;;  %v4363_v41 = vld [vmem:[#allocation8 + $0x2c4] sm:$0xf]  ;;  %v3226_v49 = vor.u32 %v4331_v37, %v3223_v40 }
  0x55   :  { %v3509_v61 = vld [vmem:[#allocation8 + $0x400] sm:$0xf]  ;;  %v4405_v62 = vld [vmem:[#allocation8 + $0x40c] sm:$0xf0]  ;;  %v3910_v11 = vor.u32 %v4505_v60, %v3909_v59  ;;  %1773 = vmatpush.bf16.msrb.mxu1 %v3654_v5  ;;  %v3351_v42 = vld [vmem:[#allocation8 + $0x2d0] sm:$0xf0] }
  0x56   :  { %v3637_v0 = vld [vmem:[#allocation8 + $0x500] sm:$0xf]  ;;  %v4437_v2 = vld [vmem:[#allocation8 + $0x50c] sm:$0xf0]  ;;  %v3510_v19 = vor.u32 %v4405_v62, %v3509_v61  ;;  %1787 = vmatpush.bf16.msrb.mxu2 %v3782_v6  ;;  %v4395_v45 = vld [vmem:[#allocation8 + $0x3c4] sm:$0xf]  ;;  %v3354_v50 = vor.u32 %v4363_v41, %v3351_v42 }
  0x57   :  { %v3765_v3 = vld [vmem:[#allocation8 + $0x600] sm:$0xf]  ;;  %v4469_v4 = vld [vmem:[#allocation8 + $0x60c] sm:$0xf0]  ;;  %v3638_v23 = vor.u32 %v4437_v2, %v3637_v0  ;;  %1801 = vmatpush.bf16.msrb.mxu3 %v3910_v11  ;;  %v3479_v46 = vld [vmem:[#allocation8 + $0x3d0] sm:$0xf0] }
  0x58   :  { %v3893_v7 = vld [vmem:[#allocation8 + $0x700] sm:$0xf]  ;;  %v4501_v8 = vld [vmem:[#allocation8 + $0x70c] sm:$0xf0]  ;;  %v3766_v24 = vor.u32 %v4469_v4, %v3765_v3  ;;  %1760 = vmatpush.bf16.msrb.mxu0 %v3510_v19  ;;  %v4295_v51 = vld [vmem:[#allocation8 + $0xa4] sm:$0xf]  ;;  %v3482_v54 = vor.u32 %v4395_v45, %v3479_v46 }
  0x59   :  { %v131_v21 = vld [vmem:[#allocation5 + $0x20] sm:$0xff]  ;;  %v133_v25 = vld [vmem:[#allocation5 + $0x30] sm:$0xff]  ;;  %v3894_v28 = vor.u32 %v4501_v8, %v3893_v7  ;;  %1774 = vmatpush.bf16.msrb.mxu1 %v3638_v23 }
  0x5a   :  { %v139_v22 = vld [vmem:[#allocation5 + $0x60] sm:$0xff]  ;;  %v141_v26 = vld [vmem:[#allocation5 + $0x70] sm:$0xff]  ;;  %1788 = vmatpush.bf16.msrb.mxu2 %v3766_v24 }
  0x5b   :  { %v4864_v39 = vpack.c.bf16 %v139_v22, %v131_v21  ;;  %v4866_v43 = vpack.c.bf16 %v141_v26, %v133_v25  ;;  %1802 = vmatpush.bf16.msrb.mxu3 %v3894_v28  ;;  %v3079_v52 = vld [vmem:[#allocation8 + $0xb0] sm:$0xf0]  ;;  %v4327_v53 = vld [vmem:[#allocation8 + $0x1a4] sm:$0xf] }
  0x5c   :  { %1809 = vmatpush.bf16.msra.mxu0 %v3114_v29  ;;  %v3207_v55 = vld [vmem:[#allocation8 + $0x1b0] sm:$0xf0]  ;;  %v4359_v56 = vld [vmem:[#allocation8 + $0x2a4] sm:$0xf]  ;;  %1775 = vmatmul.bf16.vlgmr.msrb.gmra.mxu1 %v4868_v44  ;;  %v3082_v61 = vor.u32 %v4295_v51, %v3079_v52 }
  0x5d   :  { %1823 = vmatpush.bf16.msra.mxu1 %v3242_v33  ;;  %1761 = vmatmul.bf16.vlgmr.msrb.gmra.mxu0 %v4864_v39  ;;  %v3335_v57 = vld [vmem:[#allocation8 + $0x2b0] sm:$0xf0]  ;;  %v4391_v59 = vld [vmem:[#allocation8 + $0x3a4] sm:$0xf]  ;;  %v3210_v62 = vor.u32 %v4327_v53, %v3207_v55 }
  0x5e   :  { %1837 = vmatpush.bf16.msra.mxu2 %v3370_v34  ;;  %v3463_v60 = vld [vmem:[#allocation8 + $0x3b0] sm:$0xf0]  ;;  %1803 = vmatmul.bf16.vlgmr.msrb.gmra.mxu3 %v4870_v47  ;;  %v3338_v63 = vor.u32 %v4359_v56, %v3335_v57  ;;  %v4291_v0 = vld [vmem:[#allocation8 + $0x84] sm:$0xf] }
  0x5f   :  { %1851 = vmatpush.bf16.msra.mxu3 %v3498_v38  ;;  %1789 = vmatmul.bf16.vlgmr.msrb.gmra.mxu2 %v4866_v43  ;;  %v3063_v2 = vld [vmem:[#allocation8 + $0x90] sm:$0xf0]  ;;  %v4323_v3 = vld [vmem:[#allocation8 + $0x184] sm:$0xf]  ;;  %v3466_v4 = vor.u32 %v4391_v59, %v3463_v60 }
  0x60   :  { %1810 = vmatpush.bf16.msra.mxu0 %v3098_v48  ;;  %v3191_v5 = vld [vmem:[#allocation8 + $0x190] sm:$0xf0]  ;;  %v4355_v6 = vld [vmem:[#allocation8 + $0x284] sm:$0xf]  ;;  %v3066_v11 = vor.u32 %v4291_v0, %v3063_v2 }
  0x61   :  { %1824 = vmatpush.bf16.msra.mxu1 %v3226_v49  ;;  %v3319_v7 = vld [vmem:[#allocation8 + $0x290] sm:$0xf0]  ;;  %v4387_v8 = vld [vmem:[#allocation8 + $0x384] sm:$0xf]  ;;  %v3194_v12 = vor.u32 %v4323_v3, %v3191_v5 }
  0x62   :  { %1838 = vmatpush.bf16.msra.mxu2 %v3354_v50  ;;  %v3447_v9 = vld [vmem:[#allocation8 + $0x390] sm:$0xf0]  ;;  %v3322_v13 = vor.u32 %v4355_v6, %v3319_v7  ;;  %v4287_v14 = vld [vmem:[#allocation8 + $0x64] sm:$0xf] }
  0x63   :  { %1852 = vmatpush.bf16.msra.mxu3 %v3482_v54  ;;  %v3047_v15 = vld [vmem:[#allocation8 + $0x70] sm:$0xf0]  ;;  %v4319_v16 = vld [vmem:[#allocation8 + $0x164] sm:$0xf]  ;;  %v3450_v18 = vor.u32 %v4387_v8, %v3447_v9 }
  0x64   :  { %1811 = vmatpush.bf16.msra.mxu0 %v3082_v61  ;;  %v3175_v19 = vld [vmem:[#allocation8 + $0x170] sm:$0xf0]  ;;  %v4351_v20 = vld [vmem:[#allocation8 + $0x264] sm:$0xf]  ;;  %v3050_v24 = vor.u32 %v4287_v14, %v3047_v15 }
  0x65   :  { %1825 = vmatpush.bf16.msra.mxu1 %v3210_v62  ;;  %v3303_v21 = vld [vmem:[#allocation8 + $0x270] sm:$0xf0]  ;;  %v4383_v22 = vld [vmem:[#allocation8 + $0x364] sm:$0xf]  ;;  %v3178_v25 = vor.u32 %v4319_v16, %v3175_v19 }
  0x66   :  { %1839 = vmatpush.bf16.msra.mxu2 %v3338_v63  ;;  %v3431_v23 = vld [vmem:[#allocation8 + $0x370] sm:$0xf0]  ;;  %v3306_v26 = vor.u32 %v4351_v20, %v3303_v21  ;;  %v4283_v27 = vld [vmem:[#allocation8 + $0x44] sm:$0xf] }
  0x67   :  { %1853 = vmatpush.bf16.msra.mxu3 %v3466_v4  ;;  %v3031_v28 = vld [vmem:[#allocation8 + $0x50] sm:$0xf0]  ;;  %v4315_v29 = vld [vmem:[#allocation8 + $0x144] sm:$0xf]  ;;  %v3434_v30 = vor.u32 %v4383_v22, %v3431_v23 }
  0x68   :  { %1812 = vmatpush.bf16.msra.mxu0 %v3066_v11  ;;  %v3159_v31 = vld [vmem:[#allocation8 + $0x150] sm:$0xf0]  ;;  %v4347_v32 = vld [vmem:[#allocation8 + $0x244] sm:$0xf]  ;;  %v3034_v36 = vor.u32 %v4283_v27, %v3031_v28 }
  0x69   :  { %1826 = vmatpush.bf16.msra.mxu1 %v3194_v12  ;;  %v3287_v33 = vld [vmem:[#allocation8 + $0x250] sm:$0xf0]  ;;  %v4379_v34 = vld [vmem:[#allocation8 + $0x344] sm:$0xf]  ;;  %v3162_v37 = vor.u32 %v4315_v29, %v3159_v31 }
  0x6a   :  { %1840 = vmatpush.bf16.msra.mxu2 %v3322_v13  ;;  %v3415_v35 = vld [vmem:[#allocation8 + $0x350] sm:$0xf0]  ;;  %v3290_v38 = vor.u32 %v4347_v32, %v3287_v33  ;;  %v4279_v40 = vld [vmem:[#allocation8 + $0x24] sm:$0xf] }
  0x6b   :  { %1854 = vmatpush.bf16.msra.mxu3 %v3450_v18  ;;  %v3015_v41 = vld [vmem:[#allocation8 + $0x30] sm:$0xf0]  ;;  %v4311_v42 = vld [vmem:[#allocation8 + $0x124] sm:$0xf]  ;;  %v3418_v45 = vor.u32 %v4379_v34, %v3415_v35 }
  0x6c   :  { %1813 = vmatpush.bf16.msra.mxu0 %v3050_v24  ;;  %v3143_v46 = vld [vmem:[#allocation8 + $0x130] sm:$0xf0]  ;;  %v4343_v48 = vld [vmem:[#allocation8 + $0x224] sm:$0xf]  ;;  %v3018_v52 = vor.u32 %v4279_v40, %v3015_v41 }
  0x6d   :  { %1827 = vmatpush.bf16.msra.mxu1 %v3178_v25  ;;  %v3271_v49 = vld [vmem:[#allocation8 + $0x230] sm:$0xf0]  ;;  %v4375_v50 = vld [vmem:[#allocation8 + $0x324] sm:$0xf]  ;;  %v3146_v55 = vor.u32 %v4311_v42, %v3143_v46 }
  0x6e   :  { %1841 = vmatpush.bf16.msra.mxu2 %v3306_v26  ;;  %v3399_v51 = vld [vmem:[#allocation8 + $0x330] sm:$0xf0]  ;;  %v4275_v53 = vld [vmem:[#allocation8 + $0x4] sm:$0xf]  ;;  %v3274_v56 = vor.u32 %v4343_v48, %v3271_v49 }
  0x6f   :  { %1855 = vmatpush.bf16.msra.mxu3 %v3434_v30  ;;  %v2999_v54 = vld [vmem:[#allocation8 + $0x10] sm:$0xf0]  ;;  %v4307_v57 = vld [vmem:[#allocation8 + $0x104] sm:$0xf]  ;;  %v3402_v61 = vor.u32 %v4375_v50, %v3399_v51 }
  0x70   :  { %1814 = vmatpush.bf16.msra.mxu0 %v3034_v36  ;;  %v3127_v59 = vld [vmem:[#allocation8 + $0x110] sm:$0xf0]  ;;  %v4339_v60 = vld [vmem:[#allocation8 + $0x204] sm:$0xf]  ;;  %v3002_v5 = vor.u32 %v4275_v53, %v2999_v54 }
  0x71   :  { %1828 = vmatpush.bf16.msra.mxu1 %v3162_v37  ;;  %v3255_v62 = vld [vmem:[#allocation8 + $0x210] sm:$0xf0]  ;;  %v4371_v63 = vld [vmem:[#allocation8 + $0x304] sm:$0xf]  ;;  %v3130_v9 = vor.u32 %v4307_v57, %v3127_v59 }
  0x72   :  { %1842 = vmatpush.bf16.msra.mxu2 %v3290_v38  ;;  %v3383_v0 = vld [vmem:[#allocation8 + $0x310] sm:$0xf0]  ;;  %v4431_v2 = vld [vmem:[#allocation8 + $0x4e4] sm:$0xf]  ;;  %v3258_v11 = vor.u32 %v4339_v60, %v3255_v62 }
  0x73   :  { %1856 = vmatpush.bf16.msra.mxu3 %v3418_v45  ;;  %v3623_v3 = vld [vmem:[#allocation8 + $0x4f0] sm:$0xf0]  ;;  %v4463_v4 = vld [vmem:[#allocation8 + $0x5e4] sm:$0xf]  ;;  %v3386_v14 = vor.u32 %v4371_v63, %v3383_v0 }
  0x74   :  { %1815 = vmatpush.bf16.msra.mxu0 %v3018_v52  ;;  %v3751_v6 = vld [vmem:[#allocation8 + $0x5f0] sm:$0xf0]  ;;  %v4495_v7 = vld [vmem:[#allocation8 + $0x6e4] sm:$0xf]  ;;  %v3626_v15 = vor.u32 %v4431_v2, %v3623_v3 }
  0x75   :  { %v3879_v8 = vld [vmem:[#allocation8 + $0x6f0] sm:$0xf0]  ;;  %1829 = vmatpush.bf16.msra.mxu1 %v3146_v55  ;;  %v4527_v12 = vld [vmem:[#allocation8 + $0x7e4] sm:$0xf]  ;;  %v3754_v16 = vor.u32 %v4463_v4, %v3751_v6 }
  0x76   :  { %1843 = vmatpush.bf16.msra.mxu2 %v3274_v56  ;;  %v4007_v13 = vld [vmem:[#allocation8 + $0x7f0] sm:$0xf0]  ;;  %v3882_v18 = vor.u32 %v4495_v7, %v3879_v8  ;;  %v4427_v19 = vld [vmem:[#allocation8 + $0x4c4] sm:$0xf] }
  0x77   :  { %1857 = vmatpush.bf16.msra.mxu3 %v3402_v61  ;;  %v3607_v20 = vld [vmem:[#allocation8 + $0x4d0] sm:$0xf0]  ;;  %v4459_v21 = vld [vmem:[#allocation8 + $0x5c4] sm:$0xf]  ;;  %v4010_v22 = vor.u32 %v4527_v12, %v4007_v13 }
  0x78   :  { %1816 = vmatpush.bf16.msra.mxu0 %v3002_v5  ;;  %v3735_v23 = vld [vmem:[#allocation8 + $0x5d0] sm:$0xf0]  ;;  %v4491_v24 = vld [vmem:[#allocation8 + $0x6c4] sm:$0xf]  ;;  %v3610_v28 = vor.u32 %v4427_v19, %v3607_v20 }
  0x79   :  { %v3863_v25 = vld [vmem:[#allocation8 + $0x6d0] sm:$0xf0]  ;;  %1830 = vmatpush.bf16.msra.mxu1 %v3130_v9  ;;  %v4523_v26 = vld [vmem:[#allocation8 + $0x7c4] sm:$0xf]  ;;  %v3738_v29 = vor.u32 %v4459_v21, %v3735_v23 }
  0x7a   :  { %1844 = vmatpush.bf16.msra.mxu2 %v3258_v11  ;;  %v3991_v27 = vld [vmem:[#allocation8 + $0x7d0] sm:$0xf0]  ;;  %v3866_v30 = vor.u32 %v4491_v24, %v3863_v25  ;;  %v4423_v31 = vld [vmem:[#allocation8 + $0x4a4] sm:$0xf] }
  0x7b   :  { %1858 = vmatpush.bf16.msra.mxu3 %v3386_v14  ;;  %v3591_v32 = vld [vmem:[#allocation8 + $0x4b0] sm:$0xf0]  ;;  %v4455_v33 = vld [vmem:[#allocation8 + $0x5a4] sm:$0xf]  ;;  %v3994_v34 = vor.u32 %v4523_v26, %v3991_v27  ;;  %1817 = vmatmul.bf16.vlgmr.msra.gmra.mxu0 %v4852_v58 }
  0x7c   :  { %1865 = vmatpush.bf16.msrb.mxu0 %v3626_v15  ;;  %v3719_v35 = vld [vmem:[#allocation8 + $0x5b0] sm:$0xf0]  ;;  %v4487_v36 = vld [vmem:[#allocation8 + $0x6a4] sm:$0xf]  ;;  %1831 = vmatmul.bf16.vlgmr.msra.gmra.mxu1 %v4858_v10  ;;  %v3594_v41 = vor.u32 %v4423_v31, %v3591_v32 }
  0x7d   :  { %1879 = vmatpush.bf16.msrb.mxu1 %v3754_v16  ;;  %v3847_v37 = vld [vmem:[#allocation8 + $0x6b0] sm:$0xf0]  ;;  %v4519_v38 = vld [vmem:[#allocation8 + $0x7a4] sm:$0xf]  ;;  %1845 = vmatmul.bf16.vlgmr.msra.gmra.mxu2 %v4854_v1  ;;  %v3722_v42 = vor.u32 %v4455_v33, %v3719_v35 }
  0x7e   :  { %1893 = vmatpush.bf16.msrb.mxu2 %v3882_v18  ;;  %v3975_v40 = vld [vmem:[#allocation8 + $0x7b0] sm:$0xf0]  ;;  %1859 = vmatmul.bf16.vlgmr.msra.gmra.mxu3 %v4860_v17  ;;  %v3850_v45 = vor.u32 %v4487_v36, %v3847_v37  ;;  %v4419_v46 = vld [vmem:[#allocation8 + $0x484] sm:$0xf] }
  0x7f   :  { %1907 = vmatpush.bf16.msrb.mxu3 %v4010_v22  ;;  %v3575_v48 = vld [vmem:[#allocation8 + $0x490] sm:$0xf0]  ;;  %v4451_v49 = vld [vmem:[#allocation8 + $0x584] sm:$0xf]  ;;  %v3978_v50 = vor.u32 %v4519_v38, %v3975_v40 }
  0x80   :  { %1866 = vmatpush.bf16.msrb.mxu0 %v3610_v28  ;;  %v3703_v51 = vld [vmem:[#allocation8 + $0x590] sm:$0xf0]  ;;  %v4483_v52 = vld [vmem:[#allocation8 + $0x684] sm:$0xf]  ;;  %v3578_v56 = vor.u32 %v4419_v46, %v3575_v48  ;;  %v3117_v48 = vld [vmem:[#allocation8 + $0xe8] sm:$0xf] }
  0x81   :  { %1880 = vmatpush.bf16.msrb.mxu1 %v3738_v29  ;;  %v3831_v53 = vld [vmem:[#allocation8 + $0x690] sm:$0xf0]  ;;  %v4515_v54 = vld [vmem:[#allocation8 + $0x784] sm:$0xf]  ;;  %v3706_v57 = vor.u32 %v4451_v49, %v3703_v51  ;;  %v4306_v49 = vld [vmem:[#allocation8 + $0xf4] sm:$0xf0] }
  0x82   :  { %1894 = vmatpush.bf16.msrb.mxu2 %v3866_v30  ;;  %v3959_v55 = vld [vmem:[#allocation8 + $0x790] sm:$0xf0]  ;;  %v3834_v59 = vor.u32 %v4483_v52, %v3831_v53  ;;  %v4415_v60 = vld [vmem:[#allocation8 + $0x464] sm:$0xf]  ;;  %v4338_v52 = vld [vmem:[#allocation8 + $0x1f4] sm:$0xf0] }
  0x83   :  { %1908 = vmatpush.bf16.msrb.mxu3 %v3994_v34  ;;  %v3559_v61 = vld [vmem:[#allocation8 + $0x470] sm:$0xf0]  ;;  %v4447_v62 = vld [vmem:[#allocation8 + $0x564] sm:$0xf]  ;;  %v3962_v63 = vor.u32 %v4515_v54, %v3959_v55  ;;  %v3373_v53 = vld [vmem:[#allocation8 + $0x2e8] sm:$0xf] }
  0x84   :  { %1867 = vmatpush.bf16.msrb.mxu0 %v3594_v41  ;;  %v3687_v0 = vld [vmem:[#allocation8 + $0x570] sm:$0xf0]  ;;  %v4479_v2 = vld [vmem:[#allocation8 + $0x664] sm:$0xf]  ;;  %v3562_v6 = vor.u32 %v4415_v60, %v3559_v61  ;;  %v4370_v54 = vld [vmem:[#allocation8 + $0x2f4] sm:$0xf0]  ;;  %v3118_v61 = vor.u32 %v4306_v49, %v3117_v48 }
  0x85   :  { %1881 = vmatpush.bf16.msrb.mxu1 %v3722_v42  ;;  %v3815_v3 = vld [vmem:[#allocation8 + $0x670] sm:$0xf0]  ;;  %v4511_v4 = vld [vmem:[#allocation8 + $0x764] sm:$0xf]  ;;  %v3690_v7 = vor.u32 %v4447_v62, %v3687_v0  ;;  %v3101_v0 = vld [vmem:[#allocation8 + $0xc8] sm:$0xf] }
  0x86   :  { %1895 = vmatpush.bf16.msrb.mxu2 %v3850_v45  ;;  %v3943_v5 = vld [vmem:[#allocation8 + $0x770] sm:$0xf0]  ;;  %v3818_v8 = vor.u32 %v4479_v2, %v3815_v3  ;;  %v4411_v9 = vld [vmem:[#allocation8 + $0x444] sm:$0xf]  ;;  %v4302_v2 = vld [vmem:[#allocation8 + $0xd4] sm:$0xf0] }
  0x87   :  { %1909 = vmatpush.bf16.msrb.mxu3 %v3978_v50  ;;  %v3543_v11 = vld [vmem:[#allocation8 + $0x450] sm:$0xf0]  ;;  %v4443_v12 = vld [vmem:[#allocation8 + $0x544] sm:$0xf]  ;;  %v3946_v13 = vor.u32 %v4511_v4, %v3943_v5  ;;  %v3245_v50 = vld [vmem:[#allocation8 + $0x1e8] sm:$0xf] }
  0x88   :  { %1868 = vmatpush.bf16.msrb.mxu0 %v3578_v56  ;;  %v3671_v14 = vld [vmem:[#allocation8 + $0x550] sm:$0xf0]  ;;  %v4475_v15 = vld [vmem:[#allocation8 + $0x644] sm:$0xf]  ;;  %v3546_v20 = vor.u32 %v4411_v9, %v3543_v11  ;;  %v3246_v62 = vor.u32 %v4338_v52, %v3245_v50  ;;  %v3229_v3 = vld [vmem:[#allocation8 + $0x1c8] sm:$0xf]  ;;  %v3102_v11 = vor.u32 %v4302_v2, %v3101_v0 }
  0x89   :  { %1882 = vmatpush.bf16.msrb.mxu1 %v3706_v57  ;;  %v3799_v16 = vld [vmem:[#allocation8 + $0x650] sm:$0xf0]  ;;  %v4507_v18 = vld [vmem:[#allocation8 + $0x744] sm:$0xf]  ;;  %v3674_v21 = vor.u32 %v4443_v12, %v3671_v14  ;;  %v3501_v57 = vld [vmem:[#allocation8 + $0x3e8] sm:$0xf] }
  0x8a   :  { %1896 = vmatpush.bf16.msrb.mxu2 %v3834_v59  ;;  %v3927_v19 = vld [vmem:[#allocation8 + $0x750] sm:$0xf0]  ;;  %v3802_v22 = vor.u32 %v4475_v15, %v3799_v16  ;;  %v4407_v23 = vld [vmem:[#allocation8 + $0x424] sm:$0xf]  ;;  %v4402_v59 = vld [vmem:[#allocation8 + $0x3f4] sm:$0xf0] }
  0x8b   :  { %1910 = vmatpush.bf16.msrb.mxu3 %v3962_v63  ;;  %v3527_v24 = vld [vmem:[#allocation8 + $0x430] sm:$0xf0]  ;;  %v4439_v25 = vld [vmem:[#allocation8 + $0x524] sm:$0xf]  ;;  %v3930_v26 = vor.u32 %v4507_v18, %v3927_v19  ;;  %v3374_v63 = vor.u32 %v4370_v54, %v3373_v53  ;;  %v3502_v4 = vor.u32 %v4402_v59, %v3501_v57  ;;  %v4334_v5 = vld [vmem:[#allocation8 + $0x1d4] sm:$0xf0] }
  0x8c   :  { %1869 = vmatpush.bf16.msrb.mxu0 %v3562_v6  ;;  %v3655_v27 = vld [vmem:[#allocation8 + $0x530] sm:$0xf0]  ;;  %v4471_v28 = vld [vmem:[#allocation8 + $0x624] sm:$0xf]  ;;  %v3530_v32 = vor.u32 %v4407_v23, %v3527_v24  ;;  %v3357_v6 = vld [vmem:[#allocation8 + $0x2c8] sm:$0xf]  ;;  %v3230_v12 = vor.u32 %v4334_v5, %v3229_v3 }
  0x8d   :  { %1883 = vmatpush.bf16.msrb.mxu1 %v3690_v7  ;;  %v3783_v29 = vld [vmem:[#allocation8 + $0x630] sm:$0xf0]  ;;  %v4503_v30 = vld [vmem:[#allocation8 + $0x724] sm:$0xf]  ;;  %v3658_v35 = vor.u32 %v4439_v25, %v3655_v27  ;;  %v4366_v7 = vld [vmem:[#allocation8 + $0x2d4] sm:$0xf0] }
  0x8e   :  { %1897 = vmatpush.bf16.msrb.mxu2 %v3818_v8  ;;  %v3911_v31 = vld [vmem:[#allocation8 + $0x730] sm:$0xf0]  ;;  %v4403_v33 = vld [vmem:[#allocation8 + $0x404] sm:$0xf]  ;;  %v3786_v36 = vor.u32 %v4471_v28, %v3783_v29  ;;  %v3485_v8 = vld [vmem:[#allocation8 + $0x3c8] sm:$0xf] }
  0x8f   :  { %1911 = vmatpush.bf16.msrb.mxu3 %v3946_v13  ;;  %v3511_v34 = vld [vmem:[#allocation8 + $0x410] sm:$0xf0]  ;;  %v4435_v37 = vld [vmem:[#allocation8 + $0x504] sm:$0xf]  ;;  %v3914_v41 = vor.u32 %v4503_v30, %v3911_v31  ;;  %v4398_v9 = vld [vmem:[#allocation8 + $0x3d4] sm:$0xf0]  ;;  %v3358_v13 = vor.u32 %v4366_v7, %v3357_v6 }
  0x90   :  { %1870 = vmatpush.bf16.msrb.mxu0 %v3546_v20  ;;  %v3639_v38 = vld [vmem:[#allocation8 + $0x510] sm:$0xf0]  ;;  %v4467_v40 = vld [vmem:[#allocation8 + $0x604] sm:$0xf]  ;;  %v3514_v51 = vor.u32 %v4403_v33, %v3511_v34  ;;  %v3085_v14 = vld [vmem:[#allocation8 + $0xa8] sm:$0xf]  ;;  %v3486_v18 = vor.u32 %v4398_v9, %v3485_v8 }
  0x91   :  { %1884 = vmatpush.bf16.msrb.mxu1 %v3674_v21  ;;  %v3767_v42 = vld [vmem:[#allocation8 + $0x610] sm:$0xf0]  ;;  %v4499_v45 = vld [vmem:[#allocation8 + $0x704] sm:$0xf]  ;;  %v3642_v55 = vor.u32 %v4435_v37, %v3639_v38  ;;  %v4298_v15 = vld [vmem:[#allocation8 + $0xb4] sm:$0xf0] }
  0x92   :  { %1898 = vmatpush.bf16.msrb.mxu2 %v3802_v22  ;;  %v3895_v46 = vld [vmem:[#allocation8 + $0x710] sm:$0xf0]  ;;  %v3770_v56 = vor.u32 %v4467_v40, %v3767_v42  ;;  %v3213_v16 = vld [vmem:[#allocation8 + $0x1a8] sm:$0xf]  ;;  %v4330_v19 = vld [vmem:[#allocation8 + $0x1b4] sm:$0xf0]  ;;  %v3086_v24 = vor.u32 %v4298_v15, %v3085_v14 }
  0x93   :  { %1912 = vmatpush.bf16.msrb.mxu3 %v3930_v26  ;;  %v3898_v60 = vor.u32 %v4499_v45, %v3895_v46  ;;  %v3341_v20 = vld [vmem:[#allocation8 + $0x2a8] sm:$0xf]  ;;  %v4362_v21 = vld [vmem:[#allocation8 + $0x2b4] sm:$0xf0]  ;;  %v3214_v25 = vor.u32 %v4330_v19, %v3213_v16 }
  0x94   :  { %1871 = vmatpush.bf16.msrb.mxu0 %v3530_v32  ;;  %v3469_v22 = vld [vmem:[#allocation8 + $0x3a8] sm:$0xf]  ;;  %v4394_v23 = vld [vmem:[#allocation8 + $0x3b4] sm:$0xf0]  ;;  %v3342_v26 = vor.u32 %v4362_v21, %v3341_v20 }
  0x95   :  { %1885 = vmatpush.bf16.msrb.mxu1 %v3658_v35  ;;  %v3069_v27 = vld [vmem:[#allocation8 + $0x88] sm:$0xf]  ;;  %v4294_v28 = vld [vmem:[#allocation8 + $0x94] sm:$0xf0]  ;;  %v3470_v30 = vor.u32 %v4394_v23, %v3469_v22 }
  0x96   :  { %1899 = vmatpush.bf16.msrb.mxu2 %v3786_v36  ;;  %v3197_v29 = vld [vmem:[#allocation8 + $0x188] sm:$0xf]  ;;  %v4326_v31 = vld [vmem:[#allocation8 + $0x194] sm:$0xf0]  ;;  %v3070_v36 = vor.u32 %v4294_v28, %v3069_v27 }
  0x97   :  { %1913 = vmatpush.bf16.msrb.mxu3 %v3914_v41  ;;  %v3325_v32 = vld [vmem:[#allocation8 + $0x288] sm:$0xf]  ;;  %v4358_v33 = vld [vmem:[#allocation8 + $0x294] sm:$0xf0]  ;;  %v3198_v37 = vor.u32 %v4326_v31, %v3197_v29 }
  0x98   :  { %1872 = vmatpush.bf16.msrb.mxu0 %v3514_v51  ;;  %v3453_v34 = vld [vmem:[#allocation8 + $0x388] sm:$0xf]  ;;  %v4390_v35 = vld [vmem:[#allocation8 + $0x394] sm:$0xf0]  ;;  %v3326_v38 = vor.u32 %v4358_v33, %v3325_v32 }
  0x99   :  { %1886 = vmatpush.bf16.msrb.mxu1 %v3642_v55  ;;  %v3053_v40 = vld [vmem:[#allocation8 + $0x68] sm:$0xf]  ;;  %v4290_v41 = vld [vmem:[#allocation8 + $0x74] sm:$0xf0]  ;;  %v3454_v45 = vor.u32 %v4390_v35, %v3453_v34 }
  0x9a   :  { %1900 = vmatpush.bf16.msrb.mxu2 %v3770_v56  ;;  %v3181_v42 = vld [vmem:[#allocation8 + $0x168] sm:$0xf]  ;;  %v4322_v46 = vld [vmem:[#allocation8 + $0x174] sm:$0xf0]  ;;  %v3054_v52 = vor.u32 %v4290_v41, %v3053_v40 }
  0x9b   :  { %1914 = vmatpush.bf16.msrb.mxu3 %v3898_v60  ;;  %1873 = vmatmul.bf16.vlgmr.msrb.gmra.mxu0 %v4864_v39  ;;  %v3309_v48 = vld [vmem:[#allocation8 + $0x268] sm:$0xf]  ;;  %v4354_v49 = vld [vmem:[#allocation8 + $0x274] sm:$0xf0]  ;;  %v3182_v53 = vor.u32 %v4322_v46, %v3181_v42 }
  0x9c   :  { %1921 = vmatpush.bf16.msra.mxu0 %v3118_v61  ;;  %1887 = vmatmul.bf16.vlgmr.msrb.gmra.mxu1 %v4868_v44  ;;  %v3437_v50 = vld [vmem:[#allocation8 + $0x368] sm:$0xf]  ;;  %v4386_v51 = vld [vmem:[#allocation8 + $0x374] sm:$0xf0]  ;;  %v3310_v54 = vor.u32 %v4354_v49, %v3309_v48 }
  0x9d   :  { %1935 = vmatpush.bf16.msra.mxu1 %v3246_v62  ;;  %1901 = vmatmul.bf16.vlgmr.msrb.gmra.mxu2 %v4866_v43  ;;  %v3037_v55 = vld [vmem:[#allocation8 + $0x48] sm:$0xf]  ;;  %v4286_v56 = vld [vmem:[#allocation8 + $0x54] sm:$0xf0]  ;;  %v3438_v59 = vor.u32 %v4386_v51, %v3437_v50 }
  0x9e   :  { %1949 = vmatpush.bf16.msra.mxu2 %v3374_v63  ;;  %1915 = vmatmul.bf16.vlgmr.msrb.gmra.mxu3 %v4870_v47  ;;  %v3165_v57 = vld [vmem:[#allocation8 + $0x148] sm:$0xf]  ;;  %v4318_v60 = vld [vmem:[#allocation8 + $0x154] sm:$0xf0]  ;;  %v3038_v2 = vor.u32 %v4286_v56, %v3037_v55 }
  0x9f   :  { %1963 = vmatpush.bf16.msra.mxu3 %v3502_v4  ;;  %v3293_v61 = vld [vmem:[#allocation8 + $0x248] sm:$0xf]  ;;  %v4350_v62 = vld [vmem:[#allocation8 + $0x254] sm:$0xf0]  ;;  %v3166_v3 = vor.u32 %v4318_v60, %v3165_v57 }
  0xa0   :  { %1922 = vmatpush.bf16.msra.mxu0 %v3102_v11  ;;  %v3421_v63 = vld [vmem:[#allocation8 + $0x348] sm:$0xf]  ;;  %v4382_v0 = vld [vmem:[#allocation8 + $0x354] sm:$0xf0]  ;;  %v3294_v4 = vor.u32 %v4350_v62, %v3293_v61 }
  0xa1   :  { %1936 = vmatpush.bf16.msra.mxu1 %v3230_v12  ;;  %v3021_v5 = vld [vmem:[#allocation8 + $0x28] sm:$0xf]  ;;  %v4282_v6 = vld [vmem:[#allocation8 + $0x34] sm:$0xf0]  ;;  %v3422_v8 = vor.u32 %v4382_v0, %v3421_v63 }
  0xa2   :  { %1950 = vmatpush.bf16.msra.mxu2 %v3358_v13  ;;  %v3149_v7 = vld [vmem:[#allocation8 + $0x128] sm:$0xf]  ;;  %v4314_v9 = vld [vmem:[#allocation8 + $0x134] sm:$0xf0]  ;;  %v3022_v15 = vor.u32 %v4282_v6, %v3021_v5 }
  0xa3   :  { %1964 = vmatpush.bf16.msra.mxu3 %v3486_v18  ;;  %v3277_v11 = vld [vmem:[#allocation8 + $0x228] sm:$0xf]  ;;  %v4346_v12 = vld [vmem:[#allocation8 + $0x234] sm:$0xf0]  ;;  %v3150_v19 = vor.u32 %v4314_v9, %v3149_v7 }
  0xa4   :  { %1923 = vmatpush.bf16.msra.mxu0 %v3086_v24  ;;  %v3405_v13 = vld [vmem:[#allocation8 + $0x328] sm:$0xf]  ;;  %v4378_v14 = vld [vmem:[#allocation8 + $0x334] sm:$0xf0]  ;;  %v3278_v20 = vor.u32 %v4346_v12, %v3277_v11 }
  0xa5   :  { %1937 = vmatpush.bf16.msra.mxu1 %v3214_v25  ;;  %v3005_v16 = vld [vmem:[#allocation8 + $0x8] sm:$0xf]  ;;  %v4278_v18 = vld [vmem:[#allocation8 + $0x14] sm:$0xf0]  ;;  %v3406_v24 = vor.u32 %v4378_v14, %v3405_v13 }
  0xa6   :  { %1951 = vmatpush.bf16.msra.mxu2 %v3342_v26  ;;  %v3133_v21 = vld [vmem:[#allocation8 + $0x108] sm:$0xf]  ;;  %v4310_v22 = vld [vmem:[#allocation8 + $0x114] sm:$0xf0]  ;;  %v3006_v31 = vor.u32 %v4278_v18, %v3005_v16 }
  0xa7   :  { %1965 = vmatpush.bf16.msra.mxu3 %v3470_v30  ;;  %v3261_v23 = vld [vmem:[#allocation8 + $0x208] sm:$0xf]  ;;  %v4342_v25 = vld [vmem:[#allocation8 + $0x214] sm:$0xf0]  ;;  %v3134_v35 = vor.u32 %v4310_v22, %v3133_v21 }
  0xa8   :  { %1924 = vmatpush.bf16.msra.mxu0 %v3070_v36  ;;  %v3389_v26 = vld [vmem:[#allocation8 + $0x308] sm:$0xf]  ;;  %v4374_v27 = vld [vmem:[#allocation8 + $0x314] sm:$0xf0]  ;;  %v3262_v36 = vor.u32 %v4342_v25, %v3261_v23 }
  0xa9   :  { %1938 = vmatpush.bf16.msra.mxu1 %v3198_v37  ;;  %v3629_v28 = vld [vmem:[#allocation8 + $0x4e8] sm:$0xf]  ;;  %v4434_v29 = vld [vmem:[#allocation8 + $0x4f4] sm:$0xf0]  ;;  %v3390_v40 = vor.u32 %v4374_v27, %v3389_v26 }
  0xaa   :  { %1952 = vmatpush.bf16.msra.mxu2 %v3326_v38  ;;  %v3757_v30 = vld [vmem:[#allocation8 + $0x5e8] sm:$0xf]  ;;  %v4466_v32 = vld [vmem:[#allocation8 + $0x5f4] sm:$0xf0]  ;;  %v3630_v41 = vor.u32 %v4434_v29, %v3629_v28 }
  0xab   :  { %1966 = vmatpush.bf16.msra.mxu3 %v3454_v45  ;;  %v3885_v33 = vld [vmem:[#allocation8 + $0x6e8] sm:$0xf]  ;;  %v4498_v34 = vld [vmem:[#allocation8 + $0x6f4] sm:$0xf0]  ;;  %v3758_v42 = vor.u32 %v4466_v32, %v3757_v30 }
  0xac   :  { %1925 = vmatpush.bf16.msra.mxu0 %v3054_v52  ;;  %v4013_v37 = vld [vmem:[#allocation8 + $0x7e8] sm:$0xf]  ;;  %v4530_v38 = vld [vmem:[#allocation8 + $0x7f4] sm:$0xf0]  ;;  %v3886_v45 = vor.u32 %v4498_v34, %v3885_v33 }
  0xad   :  { %1939 = vmatpush.bf16.msra.mxu1 %v3182_v53  ;;  %v3613_v46 = vld [vmem:[#allocation8 + $0x4c8] sm:$0xf]  ;;  %v4430_v48 = vld [vmem:[#allocation8 + $0x4d4] sm:$0xf0]  ;;  %v4014_v50 = vor.u32 %v4530_v38, %v4013_v37 }
  0xae   :  { %1953 = vmatpush.bf16.msra.mxu2 %v3310_v54  ;;  %v3741_v49 = vld [vmem:[#allocation8 + $0x5c8] sm:$0xf]  ;;  %v4462_v51 = vld [vmem:[#allocation8 + $0x5d4] sm:$0xf0]  ;;  %v3614_v56 = vor.u32 %v4430_v48, %v3613_v46 }
  0xaf   :  { %1967 = vmatpush.bf16.msra.mxu3 %v3438_v59  ;;  %v3869_v52 = vld [vmem:[#allocation8 + $0x6c8] sm:$0xf]  ;;  %v4494_v53 = vld [vmem:[#allocation8 + $0x6d4] sm:$0xf0]  ;;  %v3742_v57 = vor.u32 %v4462_v51, %v3741_v49 }
  0xb0   :  { %1926 = vmatpush.bf16.msra.mxu0 %v3038_v2  ;;  %v3997_v54 = vld [vmem:[#allocation8 + $0x7c8] sm:$0xf]  ;;  %v4526_v55 = vld [vmem:[#allocation8 + $0x7d4] sm:$0xf0]  ;;  %v3870_v59 = vor.u32 %v4494_v53, %v3869_v52 }
  0xb1   :  { %1940 = vmatpush.bf16.msra.mxu1 %v3166_v3  ;;  %v3597_v60 = vld [vmem:[#allocation8 + $0x4a8] sm:$0xf]  ;;  %v4426_v61 = vld [vmem:[#allocation8 + $0x4b4] sm:$0xf0]  ;;  %v3998_v63 = vor.u32 %v4526_v55, %v3997_v54 }
  0xb2   :  { %1954 = vmatpush.bf16.msra.mxu2 %v3294_v4  ;;  %v3725_v62 = vld [vmem:[#allocation8 + $0x5a8] sm:$0xf]  ;;  %v4458_v0 = vld [vmem:[#allocation8 + $0x5b4] sm:$0xf0]  ;;  %v3598_v6 = vor.u32 %v4426_v61, %v3597_v60 }
  0xb3   :  { %1968 = vmatpush.bf16.msra.mxu3 %v3422_v8  ;;  %v3853_v2 = vld [vmem:[#allocation8 + $0x6a8] sm:$0xf]  ;;  %v4490_v3 = vld [vmem:[#allocation8 + $0x6b4] sm:$0xf0]  ;;  %v3726_v7 = vor.u32 %v4458_v0, %v3725_v62 }
  0xb4   :  { %1927 = vmatpush.bf16.msra.mxu0 %v3022_v15  ;;  %v3981_v4 = vld [vmem:[#allocation8 + $0x7a8] sm:$0xf]  ;;  %v4522_v5 = vld [vmem:[#allocation8 + $0x7b4] sm:$0xf0]  ;;  %v3854_v8 = vor.u32 %v4490_v3, %v3853_v2 }
  0xb5   :  { %1941 = vmatpush.bf16.msra.mxu1 %v3150_v19  ;;  %v3581_v9 = vld [vmem:[#allocation8 + $0x488] sm:$0xf]  ;;  %v4422_v11 = vld [vmem:[#allocation8 + $0x494] sm:$0xf0]  ;;  %v3982_v13 = vor.u32 %v4522_v5, %v3981_v4 }
  0xb6   :  { %1955 = vmatpush.bf16.msra.mxu2 %v3278_v20  ;;  %v3709_v12 = vld [vmem:[#allocation8 + $0x588] sm:$0xf]  ;;  %v4454_v14 = vld [vmem:[#allocation8 + $0x594] sm:$0xf0]  ;;  %v3582_v20 = vor.u32 %v4422_v11, %v3581_v9  ;;  %v4304_v11 = vld [vmem:[#allocation8 + $0xec] sm:$0xf] }
  0xb7   :  { %1969 = vmatpush.bf16.msra.mxu3 %v3406_v24  ;;  %v3837_v15 = vld [vmem:[#allocation8 + $0x688] sm:$0xf]  ;;  %v4486_v16 = vld [vmem:[#allocation8 + $0x694] sm:$0xf0]  ;;  %v3710_v21 = vor.u32 %v4454_v14, %v3709_v12  ;;  %v3119_v12 = vld [vmem:[#allocation8 + $0xf8] sm:$0xf0] }
  0xb8   :  { %1928 = vmatpush.bf16.msra.mxu0 %v3006_v31  ;;  %v3965_v18 = vld [vmem:[#allocation8 + $0x788] sm:$0xf]  ;;  %v4518_v19 = vld [vmem:[#allocation8 + $0x794] sm:$0xf0]  ;;  %v3838_v22 = vor.u32 %v4486_v16, %v3837_v15  ;;  %v3247_v15 = vld [vmem:[#allocation8 + $0x1f8] sm:$0xf0] }
  0xb9   :  { %1942 = vmatpush.bf16.msra.mxu1 %v3134_v35  ;;  %v3565_v23 = vld [vmem:[#allocation8 + $0x468] sm:$0xf]  ;;  %v4418_v24 = vld [vmem:[#allocation8 + $0x474] sm:$0xf0]  ;;  %v3966_v26 = vor.u32 %v4518_v19, %v3965_v18  ;;  %v4368_v16 = vld [vmem:[#allocation8 + $0x2ec] sm:$0xf] }
  0xba   :  { %1956 = vmatpush.bf16.msra.mxu2 %v3262_v36  ;;  %v3693_v25 = vld [vmem:[#allocation8 + $0x568] sm:$0xf]  ;;  %v4450_v27 = vld [vmem:[#allocation8 + $0x574] sm:$0xf0]  ;;  %v3566_v32 = vor.u32 %v4418_v24, %v3565_v23  ;;  %v3375_v18 = vld [vmem:[#allocation8 + $0x2f8] sm:$0xf0]  ;;  %v3122_v24 = vor.u32 %v4304_v11, %v3119_v12 }
  0xbb   :  { %1970 = vmatpush.bf16.msra.mxu3 %v3390_v40  ;;  %1929 = vmatmul.bf16.vlgmr.msra.gmra.mxu0 %v4852_v58  ;;  %v3821_v28 = vld [vmem:[#allocation8 + $0x668] sm:$0xf]  ;;  %v4482_v29 = vld [vmem:[#allocation8 + $0x674] sm:$0xf0]  ;;  %v3694_v33 = vor.u32 %v4450_v27, %v3693_v25  ;;  %v4300_v27 = vld [vmem:[#allocation8 + $0xcc] sm:$0xf] }
  0xbc   :  { %1977 = vmatpush.bf16.msrb.mxu0 %v3630_v41  ;;  %1943 = vmatmul.bf16.vlgmr.msra.gmra.mxu1 %v4858_v10  ;;  %v3949_v30 = vld [vmem:[#allocation8 + $0x768] sm:$0xf]  ;;  %v4514_v31 = vld [vmem:[#allocation8 + $0x774] sm:$0xf0]  ;;  %v3822_v34 = vor.u32 %v4482_v29, %v3821_v28  ;;  %v3103_v28 = vld [vmem:[#allocation8 + $0xd8] sm:$0xf0] }
  0xbd   :  { %1991 = vmatpush.bf16.msrb.mxu1 %v3758_v42  ;;  %1957 = vmatmul.bf16.vlgmr.msra.gmra.mxu2 %v4854_v1  ;;  %v3549_v35 = vld [vmem:[#allocation8 + $0x448] sm:$0xf]  ;;  %v4414_v36 = vld [vmem:[#allocation8 + $0x454] sm:$0xf0]  ;;  %v3950_v38 = vor.u32 %v4514_v31, %v3949_v30  ;;  %v4332_v29 = vld [vmem:[#allocation8 + $0x1cc] sm:$0xf] }
  0xbe   :  { %2005 = vmatpush.bf16.msrb.mxu2 %v3886_v45  ;;  %1971 = vmatmul.bf16.vlgmr.msra.gmra.mxu3 %v4860_v17  ;;  %v3677_v37 = vld [vmem:[#allocation8 + $0x548] sm:$0xf]  ;;  %v4446_v40 = vld [vmem:[#allocation8 + $0x554] sm:$0xf0]  ;;  %v3550_v48 = vor.u32 %v4414_v36, %v3549_v35  ;;  %v3231_v31 = vld [vmem:[#allocation8 + $0x1d8] sm:$0xf0]  ;;  %v3106_v36 = vor.u32 %v4300_v27, %v3103_v28 }
  0xbf   :  { %2019 = vmatpush.bf16.msrb.mxu3 %v4014_v50  ;;  %v3805_v41 = vld [vmem:[#allocation8 + $0x648] sm:$0xf]  ;;  %v4478_v42 = vld [vmem:[#allocation8 + $0x654] sm:$0xf0]  ;;  %v3678_v49 = vor.u32 %v4446_v40, %v3677_v37  ;;  %v3487_v35 = vld [vmem:[#allocation8 + $0x3d8] sm:$0xf0]  ;;  %v3234_v37 = vor.u32 %v4332_v29, %v3231_v31 }
  0xc0   :  { %1978 = vmatpush.bf16.msrb.mxu0 %v3614_v56  ;;  %v3933_v45 = vld [vmem:[#allocation8 + $0x748] sm:$0xf]  ;;  %v4510_v46 = vld [vmem:[#allocation8 + $0x754] sm:$0xf0]  ;;  %v3806_v50 = vor.u32 %v4478_v42, %v3805_v41  ;;  %v4296_v40 = vld [vmem:[#allocation8 + $0xac] sm:$0xf] }
  0xc1   :  { %1992 = vmatpush.bf16.msrb.mxu1 %v3742_v57  ;;  %v3533_v51 = vld [vmem:[#allocation8 + $0x428] sm:$0xf]  ;;  %v4410_v52 = vld [vmem:[#allocation8 + $0x434] sm:$0xf0]  ;;  %v3934_v54 = vor.u32 %v4510_v46, %v3933_v45  ;;  %v3087_v41 = vld [vmem:[#allocation8 + $0xb8] sm:$0xf0] }
  0xc2   :  { %2006 = vmatpush.bf16.msrb.mxu2 %v3870_v59  ;;  %v3661_v53 = vld [vmem:[#allocation8 + $0x528] sm:$0xf]  ;;  %v4442_v55 = vld [vmem:[#allocation8 + $0x534] sm:$0xf0]  ;;  %v3534_v61 = vor.u32 %v4410_v52, %v3533_v51  ;;  %v4328_v42 = vld [vmem:[#allocation8 + $0x1ac] sm:$0xf]  ;;  %v3090_v52 = vor.u32 %v4296_v40, %v3087_v41 }
  0xc3   :  { %2020 = vmatpush.bf16.msrb.mxu3 %v3998_v63  ;;  %v3789_v56 = vld [vmem:[#allocation8 + $0x628] sm:$0xf]  ;;  %v4474_v57 = vld [vmem:[#allocation8 + $0x634] sm:$0xf0]  ;;  %v3662_v0 = vor.u32 %v4442_v55, %v3661_v53  ;;  %v3215_v46 = vld [vmem:[#allocation8 + $0x1b8] sm:$0xf0] }
  0xc4   :  { %1979 = vmatpush.bf16.msrb.mxu0 %v3598_v6  ;;  %v3917_v59 = vld [vmem:[#allocation8 + $0x728] sm:$0xf]  ;;  %v4506_v60 = vld [vmem:[#allocation8 + $0x734] sm:$0xf0]  ;;  %v3790_v2 = vor.u32 %v4474_v57, %v3789_v56  ;;  %v3471_v51 = vld [vmem:[#allocation8 + $0x3b8] sm:$0xf0]  ;;  %v3218_v53 = vor.u32 %v4328_v42, %v3215_v46 }
  0xc5   :  { %1993 = vmatpush.bf16.msrb.mxu1 %v3726_v7  ;;  %v3517_v62 = vld [vmem:[#allocation8 + $0x408] sm:$0xf]  ;;  %v4406_v63 = vld [vmem:[#allocation8 + $0x414] sm:$0xf0]  ;;  %v3918_v6 = vor.u32 %v4506_v60, %v3917_v59  ;;  %v4292_v55 = vld [vmem:[#allocation8 + $0x8c] sm:$0xf] }
  0xc6   :  { %2007 = vmatpush.bf16.msrb.mxu2 %v3854_v8  ;;  %v3645_v3 = vld [vmem:[#allocation8 + $0x508] sm:$0xf]  ;;  %v4438_v4 = vld [vmem:[#allocation8 + $0x514] sm:$0xf0]  ;;  %v3518_v14 = vor.u32 %v4406_v63, %v3517_v62  ;;  %v3071_v56 = vld [vmem:[#allocation8 + $0x98] sm:$0xf0] }
  0xc7   :  { %2021 = vmatpush.bf16.msrb.mxu3 %v3982_v13  ;;  %v3773_v5 = vld [vmem:[#allocation8 + $0x608] sm:$0xf]  ;;  %v4470_v7 = vld [vmem:[#allocation8 + $0x614] sm:$0xf0]  ;;  %v4336_v13 = vld [vmem:[#allocation8 + $0x1ec] sm:$0xf]  ;;  %v3646_v19 = vor.u32 %v4438_v4, %v3645_v3  ;;  %v4892_v3 = vpop.f32.mrf.mxu0 }
  0xc8   :  { %1980 = vmatpush.bf16.msrb.mxu0 %v3582_v20  ;;  %v3901_v8 = vld [vmem:[#allocation8 + $0x708] sm:$0xf]  ;;  %v4502_v9 = vld [vmem:[#allocation8 + $0x714] sm:$0xf0]  ;;  %v3774_v20 = vor.u32 %v4470_v7, %v3773_v5  ;;  %v3250_v25 = vor.u32 %v4336_v13, %v3247_v15  ;;  %v4324_v57 = vld [vmem:[#allocation8 + $0x18c] sm:$0xf] }
  0xc9   :  { %1994 = vmatpush.bf16.msrb.mxu1 %v3710_v21  ;;  %v4400_v21 = vld [vmem:[#allocation8 + $0x3ec] sm:$0xf]  ;;  %v3902_v23 = vor.u32 %v4502_v9, %v3901_v8  ;;  %v3199_v60 = vld [vmem:[#allocation8 + $0x198] sm:$0xf0]  ;;  %v4894_v9 = vpop.f32.mrf.mxu1 }
  0xca   :  { %2008 = vmatpush.bf16.msrb.mxu2 %v3838_v22  ;;  %v3503_v22 = vld [vmem:[#allocation8 + $0x3f8] sm:$0xf0]  ;;  %v4388_v63 = vld [vmem:[#allocation8 + $0x38c] sm:$0xf]  ;;  %v3202_v4 = vor.u32 %v4324_v57, %v3199_v60 }
  0xcb   :  { %2022 = vmatpush.bf16.msrb.mxu3 %v3966_v26  ;;  %v3378_v26 = vor.u32 %v4368_v16, %v3375_v18  ;;  %v3506_v30 = vor.u32 %v4400_v21, %v3503_v22  ;;  %v3327_v62 = vld [vmem:[#allocation8 + $0x298] sm:$0xf0]  ;;  %v4320_v8 = vld [vmem:[#allocation8 + $0x16c] sm:$0xf] }
  0xcc   :  { %1981 = vmatpush.bf16.msrb.mxu0 %v3566_v32  ;;  %v4364_v32 = vld [vmem:[#allocation8 + $0x2cc] sm:$0xf]  ;;  %v3055_v7 = vld [vmem:[#allocation8 + $0x78] sm:$0xf0] }
  0xcd   :  { %1995 = vmatpush.bf16.msrb.mxu1 %v3694_v33  ;;  %v3359_v33 = vld [vmem:[#allocation8 + $0x2d8] sm:$0xf0]  ;;  %v4352_v13 = vld [vmem:[#allocation8 + $0x26c] sm:$0xf] }
  0xce   :  { %2009 = vmatpush.bf16.msrb.mxu2 %v3822_v34  ;;  %v4396_v34 = vld [vmem:[#allocation8 + $0x3cc] sm:$0xf]  ;;  %v3183_v12 = vld [vmem:[#allocation8 + $0x178] sm:$0xf0] }
  0xcf   :  { %2023 = vmatpush.bf16.msrb.mxu3 %v3950_v38  ;;  %v3362_v38 = vor.u32 %v4364_v32, %v3359_v33  ;;  %v3490_v45 = vor.u32 %v4396_v34, %v3487_v35  ;;  %v4384_v15 = vld [vmem:[#allocation8 + $0x36c] sm:$0xf]  ;;  %v3439_v16 = vld [vmem:[#allocation8 + $0x378] sm:$0xf0]  ;;  %v4898_v32 = vpop.f32.mrf.mxu3 }
  0xd0   :  { %1982 = vmatpush.bf16.msrb.mxu0 %v3550_v48  ;;  %v4360_v48 = vld [vmem:[#allocation8 + $0x2ac] sm:$0xf]  ;;  %v3039_v22 = vld [vmem:[#allocation8 + $0x58] sm:$0xf0] }
  0xd1   :  { %1996 = vmatpush.bf16.msrb.mxu1 %v3678_v49  ;;  %v3343_v49 = vld [vmem:[#allocation8 + $0x2b8] sm:$0xf0]  ;;  %v4284_v21 = vld [vmem:[#allocation8 + $0x4c] sm:$0xf] }
  0xd2   :  { %2010 = vmatpush.bf16.msrb.mxu2 %v3806_v50  ;;  %v4392_v50 = vld [vmem:[#allocation8 + $0x3ac] sm:$0xf]  ;;  %v3295_v27 = vld [vmem:[#allocation8 + $0x258] sm:$0xf0]  ;;  %v3042_v31 = vor.u32 %v4284_v21, %v3039_v22 }
  0xd3   :  { %2024 = vmatpush.bf16.msrb.mxu3 %v3934_v54  ;;  %v3346_v54 = vor.u32 %v4360_v48, %v3343_v49  ;;  %v3474_v59 = vor.u32 %v4392_v50, %v3471_v51  ;;  %v4380_v28 = vld [vmem:[#allocation8 + $0x34c] sm:$0xf]  ;;  %v3423_v29 = vld [vmem:[#allocation8 + $0x358] sm:$0xf0]  ;;  %v4902_v49 = vpop.f32.mrf.mxu1 }
  0xd4   :  { %1983 = vmatpush.bf16.msrb.mxu0 %v3534_v61  ;;  %v4356_v61 = vld [vmem:[#allocation8 + $0x28c] sm:$0xf]  ;;  %v3151_v40 = vld [vmem:[#allocation8 + $0x138] sm:$0xf0] }
  0xd5   :  { %1997 = vmatpush.bf16.msrb.mxu1 %v3662_v0  ;;  %v3455_v0 = vld [vmem:[#allocation8 + $0x398] sm:$0xf0]  ;;  %v3330_v5 = vor.u32 %v4356_v61, %v3327_v62  ;;  %v4280_v35 = vld [vmem:[#allocation8 + $0x2c] sm:$0xf] }
  0xd6   :  { %2011 = vmatpush.bf16.msrb.mxu2 %v3790_v2  ;;  %v3074_v2 = vor.u32 %v4292_v55, %v3071_v56  ;;  %v3458_v11 = vor.u32 %v4388_v63, %v3455_v0  ;;  %v4344_v41 = vld [vmem:[#allocation8 + $0x22c] sm:$0xf]  ;;  %v3279_v42 = vld [vmem:[#allocation8 + $0x238] sm:$0xf0] }
  0xd7   :  { %2025 = vmatpush.bf16.msrb.mxu3 %v3918_v6  ;;  %v4288_v6 = vld [vmem:[#allocation8 + $0x6c] sm:$0xf]  ;;  %v3407_v48 = vld [vmem:[#allocation8 + $0x338] sm:$0xf0] }
  0xd8   :  { %1984 = vmatpush.bf16.msrb.mxu0 %v3518_v14  ;;  %v3311_v14 = vld [vmem:[#allocation8 + $0x278] sm:$0xf0]  ;;  %v3058_v18 = vor.u32 %v4288_v6, %v3055_v7  ;;  %v4376_v46 = vld [vmem:[#allocation8 + $0x32c] sm:$0xf] }
  0xd9   :  { %1998 = vmatpush.bf16.msrb.mxu1 %v3646_v19  ;;  %v3186_v19 = vor.u32 %v4320_v8, %v3183_v12  ;;  %v4276_v51 = vld [vmem:[#allocation8 + $0xc] sm:$0xf]  ;;  %v3135_v56 = vld [vmem:[#allocation8 + $0x118] sm:$0xf0] }
  0xda   :  { %2012 = vmatpush.bf16.msrb.mxu2 %v3774_v20  ;;  %v3314_v20 = vor.u32 %v4352_v13, %v3311_v14  ;;  %v4308_v55 = vld [vmem:[#allocation8 + $0x10c] sm:$0xf]  ;;  %v3263_v60 = vld [vmem:[#allocation8 + $0x218] sm:$0xf0] }
  0xdb   :  { %2026 = vmatpush.bf16.msrb.mxu3 %v3902_v23  ;;  %1985 = vmatmul.bf16.vlgmr.msrb.gmra.mxu0 %v4864_v39  ;;  %v4316_v23 = vld [vmem:[#allocation8 + $0x14c] sm:$0xf]  ;;  %v3391_v62 = vld [vmem:[#allocation8 + $0x318] sm:$0xf0]  ;;  %v3138_v8 = vor.u32 %v4308_v55, %v3135_v56 }
  0xdc   :  { %2033 = vmatpush.bf16.msra.mxu0 %v3122_v24  ;;  %1999 = vmatmul.bf16.vlgmr.msrb.gmra.mxu1 %v4868_v44  ;;  %v3442_v24 = vor.u32 %v4384_v15, %v3439_v16  ;;  %v4340_v57 = vld [vmem:[#allocation8 + $0x20c] sm:$0xf]  ;;  %v3631_v0 = vld [vmem:[#allocation8 + $0x4f8] sm:$0xf0] }
  0xdd   :  { %2047 = vmatpush.bf16.msra.mxu1 %v3250_v25  ;;  %2013 = vmatmul.bf16.vlgmr.msrb.gmra.mxu2 %v4866_v43  ;;  %v3167_v25 = vld [vmem:[#allocation8 + $0x158] sm:$0xf0]  ;;  %v4372_v61 = vld [vmem:[#allocation8 + $0x30c] sm:$0xf] }
  0xde   :  { %2061 = vmatpush.bf16.msra.mxu2 %v3378_v26  ;;  %2027 = vmatmul.bf16.vlgmr.msrb.gmra.mxu3 %v4870_v47  ;;  %v4348_v26 = vld [vmem:[#allocation8 + $0x24c] sm:$0xf]  ;;  %v3170_v33 = vor.u32 %v4316_v23, %v3167_v25  ;;  %v3887_v7 = vld [vmem:[#allocation8 + $0x6f8] sm:$0xf0]  ;;  %v3394_v15 = vor.u32 %v4372_v61, %v3391_v62 }
  0xdf   :  { %2075 = vmatpush.bf16.msra.mxu3 %v3506_v30  ;;  %v4896_v30 = vpop.f32.mrf.mxu2  ;;  %v3298_v34 = vor.u32 %v4348_v26, %v3295_v27  ;;  %v4432_v63 = vld [vmem:[#allocation8 + $0x4ec] sm:$0xf]  ;;  %v4015_v13 = vld [vmem:[#allocation8 + $0x7f8] sm:$0xf0] }
  0xe0   :  { %2034 = vmatpush.bf16.msra.mxu0 %v3106_v36  ;;  %v3023_v36 = vld [vmem:[#allocation8 + $0x38] sm:$0xf0]  ;;  %v4496_v6 = vld [vmem:[#allocation8 + $0x6ec] sm:$0xf]  ;;  %v3634_v16 = vor.u32 %v4432_v63, %v3631_v0 }
  0xe1   :  { %2048 = vmatpush.bf16.msra.mxu1 %v3234_v37  ;;  %v4312_v37 = vld [vmem:[#allocation8 + $0x12c] sm:$0xf]  ;;  %v3026_v50 = vor.u32 %v4280_v35, %v3023_v36  ;;  %v3615_v22 = vld [vmem:[#allocation8 + $0x4d8] sm:$0xf0] }
  0xe2   :  { %2062 = vmatpush.bf16.msra.mxu2 %v3362_v38  ;;  %v3426_v38 = vor.u32 %v4380_v28, %v3423_v29  ;;  %v4528_v12 = vld [vmem:[#allocation8 + $0x7ec] sm:$0xf]  ;;  %v3743_v25 = vld [vmem:[#allocation8 + $0x5d8] sm:$0xf0] }
  0xe3   :  { %2076 = vmatpush.bf16.msra.mxu3 %v3490_v45  ;;  %v4900_v45 = vpop.f32.mrf.mxu0  ;;  %v4428_v21 = vld [vmem:[#allocation8 + $0x4cc] sm:$0xf]  ;;  %v3871_v27 = vld [vmem:[#allocation8 + $0x6d8] sm:$0xf0] }
  0xe4   :  { %2035 = vmatpush.bf16.msra.mxu0 %v3090_v52  ;;  %v3007_v52 = vld [vmem:[#allocation8 + $0x18] sm:$0xf0]  ;;  %v4460_v23 = vld [vmem:[#allocation8 + $0x5cc] sm:$0xf] }
  0xe5   :  { %2049 = vmatpush.bf16.msra.mxu1 %v3218_v53  ;;  %v3154_v53 = vor.u32 %v4312_v37, %v3151_v40  ;;  %v4492_v26 = vld [vmem:[#allocation8 + $0x6cc] sm:$0xf]  ;;  %v3746_v35 = vor.u32 %v4460_v23, %v3743_v25  ;;  %v3583_v56 = vld [vmem:[#allocation8 + $0x498] sm:$0xf0] }
  0xe6   :  { %2063 = vmatpush.bf16.msra.mxu2 %v3346_v54  ;;  %v3282_v54 = vor.u32 %v4344_v41, %v3279_v42  ;;  %v4524_v29 = vld [vmem:[#allocation8 + $0x7cc] sm:$0xf]  ;;  %v3874_v36 = vor.u32 %v4492_v26, %v3871_v27  ;;  %v3727_v42 = vld [vmem:[#allocation8 + $0x5b8] sm:$0xf0] }
  0xe7   :  { %2077 = vmatpush.bf16.msra.mxu3 %v3474_v59  ;;  %v3410_v59 = vor.u32 %v4376_v46, %v3407_v48  ;;  %v4904_v14 = vpop.f32.mrf.mxu2  ;;  %v4424_v37 = vld [vmem:[#allocation8 + $0x4ac] sm:$0xf]  ;;  %v3855_v48 = vld [vmem:[#allocation8 + $0x6b8] sm:$0xf0] }
  0xe8   :  { %2036 = vmatpush.bf16.msra.mxu0 %v3074_v2  ;;  %v4464_v2 = vld [vmem:[#allocation8 + $0x5ec] sm:$0xf]  ;;  %v3967_v63 = vld [vmem:[#allocation8 + $0x798] sm:$0xf0] }
  0xe9   :  { %2050 = vmatpush.bf16.msra.mxu1 %v3202_v4  ;;  %v3010_v4 = vor.u32 %v4276_v51, %v3007_v52  ;;  %v4456_v40 = vld [vmem:[#allocation8 + $0x5ac] sm:$0xf]  ;;  %v3983_v51 = vld [vmem:[#allocation8 + $0x7b8] sm:$0xf0] }
  0xea   :  { %2064 = vmatpush.bf16.msra.mxu2 %v3330_v5  ;;  %v3759_v5 = vld [vmem:[#allocation8 + $0x5f8] sm:$0xf0]  ;;  %v4488_v46 = vld [vmem:[#allocation8 + $0x6ac] sm:$0xf] }
  0xeb   :  { %2078 = vmatpush.bf16.msra.mxu3 %v3458_v11  ;;  %v3266_v11 = vor.u32 %v4340_v57, %v3263_v60  ;;  %v4908_v28 = vpop.f32.mrf.mxu0  ;;  %v4420_v55 = vld [vmem:[#allocation8 + $0x48c] sm:$0xf]  ;;  %v3711_v60 = vld [vmem:[#allocation8 + $0x598] sm:$0xf0] }
  0xec   :  { %2037 = vmatpush.bf16.msra.mxu0 %v3058_v18  ;;  %v4906_v18 = vpop.f32.mrf.mxu3  ;;  %v4484_v61 = vld [vmem:[#allocation8 + $0x68c] sm:$0xf]  ;;  %v3679_v27 = vld [vmem:[#allocation8 + $0x558] sm:$0xf0] }
  0xed   :  { %2051 = vmatpush.bf16.msra.mxu1 %v3186_v19  ;;  %v3762_v19 = vor.u32 %v4464_v2, %v3759_v5  ;;  %v4416_v5 = vld [vmem:[#allocation8 + $0x46c] sm:$0xf] }
  0xee   :  { %2065 = vmatpush.bf16.msra.mxu2 %v3314_v20  ;;  %v3890_v20 = vor.u32 %v4496_v6, %v3887_v7  ;;  %v3567_v6 = vld [vmem:[#allocation8 + $0x478] sm:$0xf0]  ;;  %v4448_v7 = vld [vmem:[#allocation8 + $0x56c] sm:$0xf] }
  0xef   :  { %2079 = vmatpush.bf16.msra.mxu3 %v3442_v24  ;;  %v4018_v24 = vor.u32 %v4528_v12, %v4015_v13  ;;  %v4916_v57 = vpop.f32.mrf.mxu2  ;;  %v3695_v12 = vld [vmem:[#allocation8 + $0x578] sm:$0xf0]  ;;  %v4480_v13 = vld [vmem:[#allocation8 + $0x66c] sm:$0xf] }
  0xf0   :  { %2038 = vmatpush.bf16.msra.mxu0 %v3042_v31  ;;  %v3999_v31 = vld [vmem:[#allocation8 + $0x7d8] sm:$0xf0]  ;;  %v4412_v23 = vld [vmem:[#allocation8 + $0x44c] sm:$0xf] }
  0xf1   :  { %2052 = vmatpush.bf16.msra.mxu1 %v3170_v33  ;;  %v4910_v33 = vpop.f32.mrf.mxu1  ;;  %v4002_v41 = vor.u32 %v4524_v29, %v3999_v31  ;;  %v4444_v25 = vld [vmem:[#allocation8 + $0x54c] sm:$0xf]  ;;  %v3807_v31 = vld [vmem:[#allocation8 + $0x658] sm:$0xf0] }
  0xf2   :  { %2066 = vmatpush.bf16.msra.mxu2 %v3298_v34  ;;  %v3618_v34 = vor.u32 %v4428_v21, %v3615_v22  ;;  %v3698_v21 = vor.u32 %v4448_v7, %v3695_v12  ;;  %v4476_v29 = vld [vmem:[#allocation8 + $0x64c] sm:$0xf]  ;;  %v3647_v7 = vld [vmem:[#allocation8 + $0x518] sm:$0xf0] }
  0xf3   :  { %2080 = vmatpush.bf16.msra.mxu3 %v3426_v38  ;;  %v3599_v38 = vld [vmem:[#allocation8 + $0x4b8] sm:$0xf0]  ;;  %v4920_v0 = vpop.f32.mrf.mxu0 }
  0xf4   :  { %2039 = vmatpush.bf16.msra.mxu0 %v3026_v50  ;;  %v4520_v50 = vld [vmem:[#allocation8 + $0x7ac] sm:$0xf]  ;;  %v3602_v52 = vor.u32 %v4424_v37, %v3599_v38  ;;  %v4918_v62 = vpop.f32.mrf.mxu3  ;;  %v3775_v12 = vld [vmem:[#allocation8 + $0x618] sm:$0xf0] }
  0xf5   :  { %2053 = vmatpush.bf16.msra.mxu1 %v3154_v53  ;;  %v3730_v53 = vor.u32 %v4456_v40, %v3727_v42  ;;  %v3682_v42 = vor.u32 %v4444_v25, %v3679_v27 }
  0xf6   :  { %2067 = vmatpush.bf16.msra.mxu2 %v3282_v54  ;;  %v3858_v54 = vor.u32 %v4488_v46, %v3855_v48  ;;  %v3810_v46 = vor.u32 %v4476_v29, %v3807_v31 }
  0xf7   :  { %2081 = vmatpush.bf16.msra.mxu3 %v3410_v59  ;;  %v3986_v59 = vor.u32 %v4520_v50, %v3983_v51  ;;  %v4926_v37 = vpop.f32.mrf.mxu2  ;;  %v4408_v50 = vld [vmem:[#allocation8 + $0x42c] sm:$0xf]  ;;  %v3535_v51 = vld [vmem:[#allocation8 + $0x438] sm:$0xf0] }
  0xf8   :  { %2040 = vmatpush.bf16.msra.mxu0 %v3010_v4 }
  0xf9   :  { %2054 = vmatpush.bf16.msra.mxu1 %v3138_v8  ;;  %v4922_v8 = vpop.f32.mrf.mxu1 }
  0xfa   :  { %2068 = vmatpush.bf16.msra.mxu2 %v3266_v11 }
  0xfb   :  { %2082 = vmatpush.bf16.msra.mxu3 %v3394_v15  ;;  %2041 = vmatmul.bf16.vlgmr.msra.gmra.mxu0 %v4852_v58  ;;  %v3839_v58 = vld [vmem:[#allocation8 + $0x698] sm:$0xf0]  ;;  %v1818_v48 = vpop.f32.mrf.mxu0 }
  0xfc   :  { %2089 = vmatpush.bf16.msrb.mxu0 %v3634_v16  ;;  %2055 = vmatmul.bf16.vlgmr.msra.gmra.mxu1 %v4858_v10  ;;  %v3586_v10 = vor.u32 %v4420_v55, %v3583_v56  ;;  %v3842_v4 = vor.u32 %v4484_v61, %v3839_v58  ;;  %v3823_v15 = vld [vmem:[#allocation8 + $0x678] sm:$0xf0]  ;;  %v4512_v16 = vld [vmem:[#allocation8 + $0x76c] sm:$0xf]  ;;  %v3538_v58 = vor.u32 %v4408_v50, %v3535_v51 }
  0xfd   :  { %2103 = vmatpush.bf16.msrb.mxu1 %v3762_v19  ;;  %2069 = vmatmul.bf16.vlgmr.msra.gmra.mxu2 %v4854_v1  ;;  %v4452_v1 = vld [vmem:[#allocation8 + $0x58c] sm:$0xf]  ;;  %v3951_v19 = vld [vmem:[#allocation8 + $0x778] sm:$0xf0]  ;;  %v3826_v22 = vor.u32 %v4480_v13, %v3823_v15 }
  0xfe   :  { %2117 = vmatpush.bf16.msrb.mxu2 %v3890_v20  ;;  %2083 = vmatmul.bf16.vlgmr.msra.gmra.mxu3 %v4860_v17  ;;  %v4516_v17 = vld [vmem:[#allocation8 + $0x78c] sm:$0xf]  ;;  %v3714_v2 = vor.u32 %v4452_v1, %v3711_v60  ;;  %v3570_v20 = vor.u32 %v4416_v5, %v3567_v6  ;;  %v3954_v26 = vor.u32 %v4512_v16, %v3951_v19  ;;  %v3791_v56 = vld [vmem:[#allocation8 + $0x638] sm:$0xf0] }
  0xff   :  { %2131 = vmatpush.bf16.msrb.mxu3 %v4018_v24  ;;  %v3970_v11 = vor.u32 %v4516_v17, %v3967_v63  ;;  %v3551_v24 = vld [vmem:[#allocation8 + $0x458] sm:$0xf0]  ;;  %v4472_v55 = vld [vmem:[#allocation8 + $0x62c] sm:$0xf] }
 0x100   :  { %2090 = vmatpush.bf16.msrb.mxu0 %v3618_v34  ;;  %v4924_v34 = vld [vmem:[#allocation10] sm:$0xf]  ;;  %v3554_v38 = vor.u32 %v4412_v23, %v3551_v24  ;;  %v4504_v60 = vld [vmem:[#allocation8 + $0x72c] sm:$0xf]  ;;  %v3919_v61 = vld [vmem:[#allocation8 + $0x738] sm:$0xf0]  ;;  %v3794_v63 = vor.u32 %v4472_v55, %v3791_v56 }
 0x101   :  { %2104 = vmatpush.bf16.msrb.mxu1 %v3746_v35  ;;  %v4508_v35 = vld [vmem:[#allocation8 + $0x74c] sm:$0xf]  ;;  %v410_v40 = vperm.slane %v4924_v34, 1  ;;  %v1832_v1 = vpop.f32.mrf.mxu1  ;;  %v3922_v6 = vor.u32 %v4504_v60, %v3919_v61  ;;  %v3903_v16 = vld [vmem:[#allocation8 + $0x718] sm:$0xf0] }
 0x102   :  { %2118 = vmatpush.bf16.msrb.mxu2 %v3874_v36  ;;  %v3935_v36 = vld [vmem:[#allocation8 + $0x758] sm:$0xf0]  ;;  %v4500_v15 = vld [vmem:[#allocation8 + $0x70c] sm:$0xf] }
 0x103   :  { %2132 = vmatpush.bf16.msrb.mxu3 %v4002_v41  ;;  %v4929_v41 = vpop.f32.mrf.mxu3  ;;  %v1819_v5 = vadd.f32 %v1818_v48, %v410_v40  ;;  %v3906_v25 = vor.u32 %v4500_v15, %v3903_v16  ;;  %v1820_v31 = vpop.f32.mrf.mxu0  ;;  %v4536_v51 = vld [vmem:[#allocation11 + $0x28] sm:$0xff] }
 0x104   :  { %2091 = vmatpush.bf16.msrb.mxu0 %v3602_v52  ;;  %v4440_v52 = vld [vmem:[#allocation8 + $0x52c] sm:$0xf] }
 0x105   :  { %2105 = vmatpush.bf16.msrb.mxu1 %v3730_v53  ;;  %v3938_v53 = vor.u32 %v4508_v35, %v3935_v36  ;;  %v1833_v24 = vadd.f32 %v1832_v1, %v1819_v5  ;;  %v4543_v1 = vld [vmem:[#allocation11 + $0x60] sm:$0xff]  ;;  %v4540_v15 = vld [vmem:[#allocation11 + $0x48] sm:$0xff] }
 0x106   :  { %2119 = vmatpush.bf16.msrb.mxu2 %v3858_v54  ;;  %v3663_v54 = vld [vmem:[#allocation8 + $0x538] sm:$0xf0] }
 0x107   :  { %2133 = vmatpush.bf16.msrb.mxu3 %v3986_v59  ;;  %v409_v59 = vperm.slane %v4924_v34, 0  ;;  %v3666_v17 = vor.u32 %v4440_v52, %v3663_v54 }
 0x108   :  { %2092 = vmatpush.bf16.msrb.mxu0 %v3586_v10  ;;  %v4404_v10 = vld [vmem:[#allocation8 + $0x40c] sm:$0xf] }
 0x109   :  { %2106 = vmatpush.bf16.msrb.mxu1 %v3714_v2  ;;  %v3519_v2 = vld [vmem:[#allocation8 + $0x418] sm:$0xf0]  ;;  %v1707_v13 = vadd.f32 %v4892_v3, %v409_v59  ;;  %v1709_v29 = vadd.f32 %v4900_v45, %v409_v59  ;;  %v1834_v35 = vpop.f32.mrf.mxu1  ;;  %v4545_v45 = vld [vmem:[#allocation11 + $0x70] sm:$0xff] }
 0x10a   :  { %2120 = vmatpush.bf16.msrb.mxu2 %v3842_v4  ;;  %v4436_v4 = vld [vmem:[#allocation8 + $0x50c] sm:$0xf]  ;;  %v3522_v19 = vor.u32 %v4404_v10, %v3519_v2  ;;  %v4546_v3 = vld [vmem:[#allocation11 + $0x78] sm:$0xff] }
 0x10b   :  { %2134 = vmatpush.bf16.msrb.mxu3 %v3970_v11  ;;  %v4468_v11 = vld [vmem:[#allocation8 + $0x60c] sm:$0xf]  ;;  %v1860_v23 = vpop.f32.mrf.mxu3  ;;  %v1721_v27 = vadd.f32 %v4894_v9, %v1707_v13  ;;  %v1821_v9 = vadd.f32 %v1820_v31, %v410_v40 }
 0x10c   :  { %2093 = vmatpush.bf16.msrb.mxu0 %v3570_v20  ;;  %v1846_v20 = vpop.f32.mrf.mxu2  ;;  %v4544_v40 = vld [vmem:[#allocation11 + $0x68] sm:$0xff] }
 0x10d   :  { %2107 = vmatpush.bf16.msrb.mxu1 %v3698_v21  ;;  %v3650_v21 = vor.u32 %v4436_v4, %v3647_v7  ;;  %v1847_v36 = vadd.f32 %v1846_v20, %v1833_v24 }
 0x10e   :  { %2121 = vmatpush.bf16.msrb.mxu2 %v3826_v22  ;;  %v3778_v22 = vor.u32 %v4468_v11, %v3775_v12  ;;  %v4532_v11 = vld [vmem:[#allocation11 + $0x8] sm:$0xff] }
 0x10f   :  { %2135 = vmatpush.bf16.msrb.mxu3 %v3954_v26  ;;  %v4538_v26 = vld [vmem:[#allocation11 + $0x38] sm:$0xff]  ;;  %v1861_v48 = vadd.f32 %v1860_v23, %v1847_v36 }
 0x110   :  { %2094 = vmatpush.bf16.msrb.mxu0 %v3554_v38  ;;  %v4537_v38 = vld [vmem:[#allocation11 + $0x30] sm:$0xff] }
 0x111   :  { %2108 = vmatpush.bf16.msrb.mxu1 %v3682_v42  ;;  %v1735_v42 = vadd.f32 %v4896_v30, %v1721_v27 }
 0x112   :  { %2122 = vmatpush.bf16.msrb.mxu2 %v3810_v46  ;;  %v1723_v46 = vadd.f32 %v4902_v49, %v1709_v29 }
 0x113   :  { %2136 = vmatpush.bf16.msrb.mxu3 %v3938_v53  ;;  %v1749_v30 = vadd.f32 %v4898_v32, %v1735_v42  ;;  %v1862_v52 = vpop.f32.mrf.mxu3  ;;  %v4534_v32 = vld [vmem:[#allocation11 + $0x18] sm:$0xff] }
 0x114   :  { %2095 = vmatpush.bf16.msrb.mxu0 %v3538_v58  ;;  %v1848_v50 = vpop.f32.mrf.mxu2  ;;  %v1737_v49 = vadd.f32 %v4904_v14, %v1723_v46  ;;  %v4542_v58 = vld [vmem:[#allocation11 + $0x58] sm:$0xff] }
 0x115   :  { %2109 = vmatpush.bf16.msrb.mxu1 %v3666_v17 }
 0x116   :  { %2123 = vmatpush.bf16.msrb.mxu2 %v3794_v63 }
 0x117   :  { %2137 = vmatpush.bf16.msrb.mxu3 %v3922_v6  ;;  %v4541_v6 = vld [vmem:[#allocation11 + $0x50] sm:$0xff] }
 0x118   :  { %2096 = vmatpush.bf16.msrb.mxu0 %v3522_v19  ;;  %v1874_v53 = vpop.f32.mrf.mxu0 }
 0x119   :  { %2110 = vmatpush.bf16.msrb.mxu1 %v3650_v21  ;;  %v1875_v54 = vadd.f32 %v1874_v53, %v1861_v48  ;;  %v1888_v55 = vpop.f32.mrf.mxu1  ;;  %v4531_v21 = vld [vmem:[#allocation11] sm:$0xff]  ;;  %v4562_v48 = vld [vmem:[#allocation11 + $0xf8] sm:$0xff] }
 0x11a   :  { %2124 = vmatpush.bf16.msrb.mxu2 %v3778_v22 }
 0x11b   :  { %2138 = vmatpush.bf16.msrb.mxu3 %v3906_v25  ;;  %2097 = vmatmul.bf16.vlgmr.msrb.gmra.mxu0 %v4864_v39  ;;  %v1835_v39 = vadd.f32 %v1834_v35, %v1821_v9  ;;  %v1889_v59 = vadd.f32 %v1888_v55, %v1875_v54  ;;  %v4552_v54 = vld [vmem:[#allocation11 + $0xa8] sm:$0xff] }
 0x11c   :  { %2449 = vmatpush.bf16.msra.mxu0 %v4538_v26  ;;  %2111 = vmatmul.bf16.vlgmr.msrb.gmra.mxu1 %v4868_v44  ;;  %v4535_v44 = vld [vmem:[#allocation11 + $0x20] sm:$0xff]  ;;  %v4560_v55 = vld [vmem:[#allocation11 + $0xe8] sm:$0xff] }
 0x11d   :  { %2463 = vmatpush.bf16.msra.mxu1 %v4546_v3  ;;  %2125 = vmatmul.bf16.vlgmr.msrb.gmra.mxu2 %v4866_v43  ;;  %v1751_v43 = vadd.f32 %v4906_v18, %v1737_v49  ;;  %v1849_v56 = vadd.f32 %v1848_v50, %v1835_v39  ;;  %v4533_v18 = vld [vmem:[#allocation11 + $0x10] sm:$0xff] }
 0x11e   :  { %2139 = vmatmul.bf16.vlgmr.msrb.gmra.mxu3 %v4870_v47  ;;  %v1763_v47 = vadd.f32 %v4908_v28, %v1749_v30 }
 0x11f   :  { %v1765_v60 = vadd.f32 %v4920_v0, %v1751_v43  ;;  %v1863_v61 = vadd.f32 %v1862_v52, %v1849_v56  ;;  %2491 = vmatpush.bf16.msra.mxu3 %v4562_v48  ;;  %v4553_v52 = vld [vmem:[#allocation11 + $0xb0] sm:$0xff]  ;;  %v4559_v56 = vld [vmem:[#allocation11 + $0xe0] sm:$0xff] }
 0x120   :  { %2450 = vmatpush.bf16.msra.mxu0 %v4537_v38  ;;  %v1777_v14 = vadd.f32 %v4910_v33, %v1763_v47  ;;  %v1902_v17 = vpop.f32.mrf.mxu2  ;;  %v1876_v10 = vpop.f32.mrf.mxu0  ;;  %v4551_v47 = vld [vmem:[#allocation11 + $0xa0] sm:$0xff] }
 0x121   :  { %2464 = vmatpush.bf16.msra.mxu1 %v4545_v45  ;;  %v1903_v63 = vadd.f32 %v1902_v17, %v1889_v59  ;;  %v1916_v2 = vpop.f32.mrf.mxu3  ;;  %v1779_v4 = vadd.f32 %v4922_v8, %v1765_v60  ;;  %v1877_v5 = vadd.f32 %v1876_v10, %v1863_v61  ;;  %v1890_v7 = vpop.f32.mrf.mxu1  ;;  %v4554_v45 = vld [vmem:[#allocation11 + $0xb8] sm:$0xff]  ;;  %v411_v60 = vperm.slane %v4924_v34, 2  ;;  %v4557_v10 = vld [vmem:[#allocation11 + $0xd0] sm:$0xff] }
 0x122   :  { %v1791_v28 = vadd.f32 %v4916_v57, %v1777_v14  ;;  %2477 = vmatpush.bf16.msra.mxu2 %v4554_v45  ;;  %v4550_v59 = vld [vmem:[#allocation11 + $0x98] sm:$0xff]  ;;  %v412_v17 = vperm.slane %v4924_v34, 3 }
 0x123   :  { %v1793_v33 = vadd.f32 %v4926_v37, %v1779_v4  ;;  %v1917_v0 = vadd.f32 %v1916_v2, %v1903_v63  ;;  %v1891_v13 = vadd.f32 %v1890_v7, %v1877_v5  ;;  %v4539_v37 = vld [vmem:[#allocation11 + $0x40] sm:$0xff]  ;;  %v4549_v63 = vld [vmem:[#allocation11 + $0x90] sm:$0xff]  ;;  %v4548_v4 = vld [vmem:[#allocation11 + $0x88] sm:$0xff] }
 0x124   :  { %2451 = vmatpush.bf16.msra.mxu0 %v4536_v51  ;;  %v1805_v12 = vadd.f32 %v4918_v62, %v1791_v28  ;;  %v4556_v5 = vld [vmem:[#allocation11 + $0xc8] sm:$0xff] }
 0x125   :  { %2465 = vmatpush.bf16.msra.mxu1 %v4544_v40  ;;  %v1807_v19 = vadd.f32 %v4929_v41, %v1793_v33  ;;  %v2146_v57 = vmax.f32 %v1917_v0, 0.0  ;;  %v4561_v40 = vld [vmem:[#allocation11 + $0xf0] sm:$0xff] }
 0x126   :  { %v2145_v22 = vmax.f32 %v1805_v12, 0.0  ;;  %2478 = vmatpush.bf16.msra.mxu2 %v4553_v52  ;;  %2492 = vmatpush.bf16.msra.mxu3 %v4561_v40  ;;  %v4555_v12 = vld [vmem:[#allocation11 + $0xc0] sm:$0xff] }
 0x127   :  { %v2149_v24 = vmax.f32 %v1807_v19, 0.0 }
 0x128   :  { %2452 = vmatpush.bf16.msra.mxu0 %v4535_v44  ;;  %v1904_v16 = vpop.f32.mrf.mxu2  ;;  %v4956_v25 = vpack.c.bf16 %v2146_v57, %v2145_v22 }
 0x129   :  { %2466 = vmatpush.bf16.msra.mxu1 %v4543_v1  ;;  %v1905_v20 = vadd.f32 %v1904_v16, %v1891_v13  ;;  %v1918_v8 = vpop.f32.mrf.mxu3 }
 0x12a   :  { %v2241_v27 = vunpack.c.l.b16 %v4956_v25  ;;  %v2242_v29 = vunpack.c.h.b16 %v4956_v25  ;;  %2479 = vmatpush.bf16.msra.mxu2 %v4552_v54  ;;  %2493 = vmatpush.bf16.msra.mxu3 %v4560_v55 }
 0x12b   :  { %v1919_v23 = vadd.f32 %v1918_v8, %v1905_v20 }
 0x12c   :  { %2453 = vmatpush.bf16.msra.mxu0 %v4534_v32  ;;  %v4558_v32 = vld [vmem:[#allocation11 + $0xd8] sm:$0xff] }
 0x12d   :  { %2467 = vmatpush.bf16.msra.mxu1 %v4542_v58  ;;  %v2150_v26 = vmax.f32 %v1919_v23, 0.0 }
 0x12e   :  { %2480 = vmatpush.bf16.msra.mxu2 %v4551_v47  ;;  %2494 = vmatpush.bf16.msra.mxu3 %v4559_v56 }
 0x12f   :  { %v4958_v62 = vpack.c.bf16 %v2150_v26, %v2149_v24 }
 0x130   :  { %2454 = vmatpush.bf16.msra.mxu0 %v4533_v18 }
 0x131   :  { %2468 = vmatpush.bf16.msra.mxu1 %v4541_v6  ;;  %v2245_v41 = vunpack.c.l.b16 %v4958_v62  ;;  %v2246_v31 = vunpack.c.h.b16 %v4958_v62 }
 0x132   :  { %2481 = vmatpush.bf16.msra.mxu2 %v4550_v59  ;;  %2495 = vmatpush.bf16.msra.mxu3 %v4558_v32 }
 0x133   :  { %v2249_v3 = vpack.c.b16 %v2245_v41, %v2241_v27  ;;  %v2250_v35 = vpack.c.b16 %v2246_v31, %v2242_v29 }
 0x134   :  { %2455 = vmatpush.bf16.msra.mxu0 %v4532_v11  ;;  %v4547_v11 = vld [vmem:[#allocation11 + $0x80] sm:$0xff] }
 0x135   :  { %2469 = vmatpush.bf16.msra.mxu1 %v4540_v15 }
 0x136   :  { %2482 = vmatpush.bf16.msra.mxu2 %v4549_v63  ;;  %2496 = vmatpush.bf16.msra.mxu3 %v4557_v10 }
 0x138   :  { %2456 = vmatpush.bf16.msra.mxu0 %v4531_v21  ;;  %v1930_v36 = vpop.f32.mrf.mxu0 }
 0x139   :  { %2470 = vmatpush.bf16.msra.mxu1 %v4539_v37  ;;  %v1944_v38 = vpop.f32.mrf.mxu1  ;;  %v1931_v18 = vadd.f32 %v1930_v36, %v411_v60 }
 0x13a   :  { %2483 = vmatpush.bf16.msra.mxu2 %v4548_v4  ;;  %2497 = vmatpush.bf16.msra.mxu3 %v4556_v5 }
 0x13b   :  { %2457 = vmatmul.bf16.vlgmr.msra.gmra.mxu0 %v2249_v3  ;;  %v1945_v7 = vadd.f32 %v1944_v38, %v1931_v18 }
 0x13c   :  { %2471 = vmatmul.bf16.vlgmr.msra.gmra.mxu1 %v2250_v35 }
 0x13e   :  { %2484 = vmatpush.bf16.msra.mxu2 %v4547_v11  ;;  %2498 = vmatpush.bf16.msra.mxu3 %v4555_v12 }
 0x140   :  { %v1958_v42 = vpop.f32.mrf.mxu2  ;;  %v1932_v9 = vpop.f32.mrf.mxu0 }
 0x141   :  { %v1972_v46 = vpop.f32.mrf.mxu3  ;;  %v1946_v50 = vpop.f32.mrf.mxu1  ;;  %v1933_v33 = vadd.f32 %v1932_v9, %v411_v60  ;;  %v1959_v34 = vadd.f32 %v1958_v42, %v1945_v7 }
 0x143   :  { %v1947_v16 = vadd.f32 %v1946_v50, %v1933_v33  ;;  %v1973_v8 = vadd.f32 %v1972_v46, %v1959_v34 }
 0x148   :  { %v1960_v51 = vpop.f32.mrf.mxu2 }
 0x149   :  { %v1974_v30 = vpop.f32.mrf.mxu3  ;;  %v1961_v21 = vadd.f32 %v1960_v51, %v1947_v16 }
 0x14b   :  { %v1975_v27 = vadd.f32 %v1974_v30, %v1961_v21 }
 0x158   :  { %v1986_v49 = vpop.f32.mrf.mxu0 }
 0x159   :  { %v4964_v39 = vpop.f32.mrf.mxu1  ;;  %v1987_v41 = vadd.f32 %v1986_v49, %v1973_v8 }
 0x15b   :  { %v2001_v35 = vadd.f32 %v4964_v39, %v1987_v41  ;;  %v4789_v41 = vmov 0.0  }
 0x15c   :  { %112 = vst.msk [vmem:[#allocation3] sm:$0x1] %vm110_vm0, %v4789_v41 }
 0x160   :  { %v4966_v53 = vpop.f32.mrf.mxu2  ;;  %v1988_v43 = vpop.f32.mrf.mxu0 }
 0x161   :  { %v4968_v44 = vpop.f32.mrf.mxu3  ;;  %v2002_v1 = vpop.f32.mrf.mxu1  ;;  %v1989_v36 = vadd.f32 %v1988_v43, %v1975_v27  ;;  %v2015_v50 = vadd.f32 %v4966_v53, %v2001_v35  ;;  %v2730_v27 = vld [vmem:[%s5022_s7] sm:$0x1] }
 0x163   :  { %v2003_v51 = vadd.f32 %v2002_v1, %v1989_v36  ;;  %v2029_v49 = vadd.f32 %v4968_v44, %v2015_v50 }
 0x165   :  { %v2147_v32 = vmax.f32 %v2029_v49, 0.0 }
 0x168   :  { %v2016_v14 = vpop.f32.mrf.mxu2 }
 0x169   :  { %v2030_v61 = vpop.f32.mrf.mxu3  ;;  %v2017_v40 = vadd.f32 %v2016_v14, %v2003_v51 }
 0x16b   :  { %v2031_v56 = vadd.f32 %v2030_v61, %v2017_v40 }
 0x178   :  { %v2042_v58 = vpop.f32.mrf.mxu0 }
 0x179   :  { %v2056_v2 = vpop.f32.mrf.mxu1  ;;  %v2043_v28 = vadd.f32 %v2042_v58, %v412_v17  ;;  %v2151_v58 = vmax.f32 %v2031_v56, 0.0 }
 0x17b   :  { %v2057_v13 = vadd.f32 %v2056_v2, %v2043_v28  ;;  %v4612_v28 = vld [vmem:[%s5019_s4] ss:$0 sm:$0xff] }
 0x180   :  { %v2070_v6 = vpop.f32.mrf.mxu2  ;;  %v2044_v15 = vpop.f32.mrf.mxu0 }
 0x181   :  { %v2084_v0 = vpop.f32.mrf.mxu3  ;;  %v2058_v19 = vpop.f32.mrf.mxu1  ;;  %v2071_v57 = vadd.f32 %v2070_v6, %v2057_v13  ;;  %v2045_v20 = vadd.f32 %v2044_v15, %v412_v17 }
 0x183   :  { %v2085_v23 = vadd.f32 %v2084_v0, %v2071_v57  ;;  %v2059_v37 = vadd.f32 %v2058_v19, %v2045_v20  ;;  %v4613_v19 = vld [vmem:[%s5020_s5] ss:$0 sm:$0xff] }
 0x188   :  { %v2072_v22 = vpop.f32.mrf.mxu2 }
 0x189   :  { %v2086_v24 = vpop.f32.mrf.mxu3  ;;  %v2073_v3 = vadd.f32 %v2072_v22, %v2059_v37 }
 0x18b   :  { %v2087_v9 = vadd.f32 %v2086_v24, %v2073_v3  ;;  %v113_v24 = vlaneseq }
 0x18d   :  { %vm4990_vm1 = vcmp.lt.s32.totalorder %v113_v24, 512 }
 0x18e   :  { %117 = vst.msk [vmem:[#allocation4] sm:$0xf] %vm4990_vm1, %v4789_v41  ;;  %v4573_v41 = vld [vmem:[#allocation13 + $0x50] sm:$0xff] }
 0x198   :  { %v2098_v26 = vpop.f32.mrf.mxu0 }
 0x199   :  { %v2099_v29 = vadd.f32 %v2098_v26, %v2085_v23  ;;  %v2112_v31 = vpop.f32.mrf.mxu1  ;;  %v4788_v26 = vmov -1e+30  }
 0x19a   :  { %111 = vst.msk [vmem:[#allocation2] sm:$0x1] %vm110_vm0, %v4788_v26  ;;  %v4565_v26 = vld [vmem:[#allocation13 + $0x10] sm:$0xff] }
 0x19b   :  { %v2113_v38 = vadd.f32 %v2112_v31, %v2099_v29  ;;  %v4790_v31 = vmov 0  }
 0x19c   :  { %4610 = vset.pattern.permute.xlu2 %v4790_v31  ;;  %4609 = vset.pattern.permute.xlu1 %v4790_v31 }
 0x19d   :  { %4611 = vset.pattern.permute.xlu0 %v4790_v31  ;;  %v4589_v31 = vld [vmem:[#allocation13 + $0xd0] sm:$0xff] }
 0x1a0   :  { %v2126_v42 = vpop.f32.mrf.mxu2  ;;  %v2100_v46 = vpop.f32.mrf.mxu0 }
 0x1a1   :  { %v2127_v45 = vadd.f32 %v2126_v42, %v2113_v38  ;;  %v2140_v48 = vpop.f32.mrf.mxu3  ;;  %v2101_v52 = vadd.f32 %v2100_v46, %v2087_v9  ;;  %v2114_v30 = vpop.f32.mrf.mxu1 }
 0x1a3   :  { %v2141_v54 = vadd.f32 %v2140_v48, %v2127_v45  ;;  %v2115_v55 = vadd.f32 %v2114_v30, %v2101_v52  ;;  %v2519_v48 = vld [vmem:[#allocation2] sm:$0x1] }
 0x1a5   :  { %v2148_v39 = vmax.f32 %v2141_v54, 0.0 }
 0x1a7   :  { %v4975_v17 = vpack.c.bf16 %v2148_v39, %v2147_v32 }
 0x1a8   :  { %v2128_v47 = vpop.f32.mrf.mxu2 }
 0x1a9   :  { %v2129_v43 = vadd.f32 %v2128_v47, %v2115_v55  ;;  %v2142_v59 = vpop.f32.mrf.mxu3  ;;  %v2243_v1 = vunpack.c.l.b16 %v4975_v17  ;;  %v2244_v44 = vunpack.c.h.b16 %v4975_v17 }
 0x1ab   :  { %v2143_v60 = vadd.f32 %v2142_v59, %v2129_v43 }
 0x1ad   :  { %v2152_v63 = vmax.f32 %v2143_v60, 0.0 }
 0x1af   :  { %v4977_v53 = vpack.c.bf16 %v2152_v63, %v2151_v58 }
 0x1b1   :  { %v2247_v14 = vunpack.c.l.b16 %v4977_v53  ;;  %v2248_v10 = vunpack.c.h.b16 %v4977_v53 }
 0x1b3   :  { %v2251_v61 = vpack.c.b16 %v2247_v14, %v2243_v1  ;;  %v2252_v2 = vpack.c.b16 %v2248_v10, %v2244_v44  ;;  %v2542_v14 = vld [vmem:[#allocation3] sm:$0x1] }
 0x1b5   :  { %2485 = vmatmul.bf16.vlgmr.msra.gmra.mxu2 %v2251_v61  ;;  %2499 = vmatmul.bf16.vlgmr.msra.gmra.mxu3 %v2252_v2 }
 0x1b8   :  { %v2458_v18 = vpop.f32.mrf.mxu0 }
 0x1b9   :  { %v2459_v4 = vadd.f32 %v4612_v28, %v2458_v18  ;;  %v2472_v5 = vpop.f32.mrf.mxu1 }
 0x1bb   :  { %v2473_v6 = vadd.f32 %v2472_v5, %v2459_v4  ;;  %v4570_v4 = vld [vmem:[#allocation13 + $0x38] sm:$0xff] }
 0x1bc   :  { %v4578_v5 = vld [vmem:[#allocation13 + $0x78] sm:$0xff]  ;;  %2923 = vmatpush.bf16.msrb.mxu0 %v4570_v4 }
 0x1bd   :  { %2936 = vmatpush.bf16.msrb.mxu1 %v4578_v5 }
 0x1c0   :  { %v2460_v7 = vpop.f32.mrf.mxu0 }
 0x1c1   :  { %v2461_v12 = vadd.f32 %v4612_v28, %v2460_v7  ;;  %v2474_v15 = vpop.f32.mrf.mxu1  ;;  %v4594_v7 = vld [vmem:[#allocation13 + $0xf8] sm:$0xff] }
 0x1c2   :  { %2962 = vmatpush.bf16.msrb.mxu3 %v4594_v7 }
 0x1c3   :  { %v2475_v34 = vadd.f32 %v2474_v15, %v2461_v12  ;;  %v4593_v12 = vld [vmem:[#allocation13 + $0xf0] sm:$0xff]  ;;  %v4576_v15 = vld [vmem:[#allocation13 + $0x68] sm:$0xff] }
 0x1c6   :  { %2963 = vmatpush.bf16.msrb.mxu3 %v4593_v12 }
 0x238   :  { %v2486_v33 = vpop.f32.mrf.mxu2  ;;  %v2500_v0 = vpop.f32.mrf.mxu3 }
 0x239   :  { %v2487_v11 = vadd.f32 %v2486_v33, %v2473_v6  ;;  %v4586_v6 = vld [vmem:[#allocation13 + $0xb8] sm:$0xff]  ;;  %v4569_v33 = vld [vmem:[#allocation13 + $0x30] sm:$0xff] }
 0x23a   :  { %2949 = vmatpush.bf16.msrb.mxu2 %v4586_v6  ;;  %2924 = vmatpush.bf16.msrb.mxu0 %v4569_v33 }
 0x23b   :  { %v2501_v13 = vadd.f32 %v2500_v0, %v2487_v11  ;;  %v4577_v0 = vld [vmem:[#allocation13 + $0x70] sm:$0xff] }
 0x23c   :  { %v4585_v11 = vld [vmem:[#allocation13 + $0xb0] sm:$0xff]  ;;  %2937 = vmatpush.bf16.msrb.mxu1 %v4577_v0 }
 0x23d   :  { %4614 = vtanh.f32 %v2501_v13  ;;  %v4568_v13 = vld [vmem:[#allocation13 + $0x28] sm:$0xff] }
 0x23e   :  { %2950 = vmatpush.bf16.msrb.mxu2 %v4585_v11  ;;  %2925 = vmatpush.bf16.msrb.mxu0 %v4568_v13 }
 0x240   :  { %v2488_v16 = vpop.f32.mrf.mxu2  ;;  %v2502_v20 = vpop.f32.mrf.mxu3  ;;  %2938 = vmatpush.bf16.msrb.mxu1 %v4576_v15 }
 0x241   :  { %v2489_v57 = vadd.f32 %v2488_v16, %v2475_v34  ;;  %v4584_v34 = vld [vmem:[#allocation13 + $0xa8] sm:$0xff] }
 0x242   :  { %v4592_v16 = vld [vmem:[#allocation13 + $0xe8] sm:$0xff]  ;;  %2951 = vmatpush.bf16.msrb.mxu2 %v4584_v34 }
 0x243   :  { %v4615_v8 = vpop.eup %4614  ;;  %v2503_v21 = vadd.f32 %v2502_v20, %v2489_v57  ;;  %2964 = vmatpush.bf16.msrb.mxu3 %v4592_v16  ;;  %v4575_v57 = vld [vmem:[#allocation13 + $0x60] sm:$0xff] }
 0x244   :  { %v2511_v22 = vmul.f32 %v4615_v8, %v4613_v19  ;;  %v4583_v20 = vld [vmem:[#allocation13 + $0xa0] sm:$0xff]  ;;  %2939 = vmatpush.bf16.msrb.mxu1 %v4575_v57 }
 0x245   :  { %4616 = vtanh.f32 %v2503_v21  ;;  %v4591_v8 = vld [vmem:[#allocation13 + $0xe0] sm:$0xff]  ;;  %v4566_v21 = vld [vmem:[#allocation13 + $0x18] sm:$0xff] }
 0x246   :  { %2513 = vadd.xlane.f32.xlu0 %v2511_v22  ;;  %2952 = vmatpush.bf16.msrb.mxu2 %v4583_v20  ;;  %v4574_v22 = vld [vmem:[#allocation13 + $0x58] sm:$0xff] }
 0x247   :  { %2965 = vmatpush.bf16.msrb.mxu3 %v4591_v8 }
 0x248   :  { %2940 = vmatpush.bf16.msrb.mxu1 %v4574_v22 }
 0x24b   :  { %v4617_v23 = vpop.eup %4616 }
 0x24c   :  { %v2512_v37 = vmul.f32 %v4617_v23, %v4613_v19  ;;  %v4567_v19 = vld [vmem:[#allocation13 + $0x20] sm:$0xff]  ;;  %v4582_v23 = vld [vmem:[#allocation13 + $0x98] sm:$0xff]  ;;  %2941 = vmatpush.bf16.msrb.mxu1 %v4573_v41 }
 0x24d   :  { %2926 = vmatpush.bf16.msrb.mxu0 %v4567_v19  ;;  %2953 = vmatpush.bf16.msrb.mxu2 %v4582_v23 }
 0x24e   :  { %2515 = vadd.xlane.f32.xlu0 %v2512_v37  ;;  %v4590_v37 = vld [vmem:[#allocation13 + $0xd8] sm:$0xff] }
 0x24f   :  { %2966 = vmatpush.bf16.msrb.mxu3 %v4590_v37 }
 0x251   :  { %2927 = vmatpush.bf16.msrb.mxu0 %v4566_v21  ;;  %v2557_v21 = vld [vmem:[#allocation4] sm:$0xf] }
 0x253   :  { %2967 = vmatpush.bf16.msrb.mxu3 %v4589_v31 }
 0x255   :  { %2928 = vmatpush.bf16.msrb.mxu0 %v4565_v26 }
 0x2b9   :  { %v2514_v29 = vpop.xlane.xlu0 %2513 }
 0x2c1   :  { %v2516_v3 = vpop.xlane.xlu0 %2515 }
 0x2c2   :  { %v2520_v35 = vmax.f32 %v2514_v29, %v2516_v3 }
 0x2c4   :  { %v2521_v36 = vrot.slane %v2520_v35, 4 }
 0x2c6   :  { %v2522_v38 = vmax.f32 %v2520_v35, %v2521_v36  ;;  %v4564_v35 = vld [vmem:[#allocation13 + $0x8] sm:$0xff] }
 0x2c7   :  { %v4572_v36 = vld [vmem:[#allocation13 + $0x48] sm:$0xff]  ;;  %2929 = vmatpush.bf16.msrb.mxu0 %v4564_v35 }
 0x2c8   :  { %v2523_v42 = vrot.slane %v2522_v38, 2  ;;  %2942 = vmatpush.bf16.msrb.mxu1 %v4572_v36 }
 0x2ca   :  { %v2524_v9 = vmax.f32 %v2522_v38, %v2523_v42  ;;  %v4580_v38 = vld [vmem:[#allocation13 + $0x88] sm:$0xff]  ;;  %v2566_v42 = vunpack.c.h.bf16 %v4956_v25 }
 0x2cc   :  { %v2525_v45 = vrot.slane %v2524_v9, 1 }
 0x2ce   :  { %v2526_v46 = vmax.f32 %v2524_v9, %v2525_v45  ;;  %v2567_v9 = vunpack.c.l.bf16 %v4975_v17  ;;  %v2568_v45 = vunpack.c.h.bf16 %v4975_v17  ;;  %v4571_v17 = vld [vmem:[#allocation13 + $0x40] sm:$0xff] }
 0x2cf   :  { %2943 = vmatpush.bf16.msrb.mxu1 %v4571_v17 }
 0x2d0   :  { %v2527_v50 = vmax.f32 %v2519_v48, %v2526_v46  ;;  %v4588_v46 = vld [vmem:[#allocation13 + $0xc8] sm:$0xff] }
 0x2d1   :  { %2968 = vmatpush.bf16.msrb.mxu3 %v4588_v46 }
 0x2d2   :  { %v2532_v51 = vperm.slane %v2527_v50, 0  ;;  %2639 = vst.msk [vmem:[#allocation2] sm:$0x1] %vm110_vm0, %v2527_v50  ;;  %v2528_v52 = vsub.f32 %v2519_v48, %v2527_v50  ;;  %v2569_v48 = vunpack.c.l.bf16 %v4958_v62 }
 0x2d4   :  { %v2534_v40 = vsub.f32 %v2514_v29, %v2532_v51  ;;  %v2535_v54 = vsub.f32 %v2516_v3, %v2532_v51  ;;  %v2529_v30 = vmul.f32 1.442695, %v2528_v52  ;;  %v4581_v29 = vld [vmem:[#allocation13 + $0x90] sm:$0xff]  ;;  %v2565_v3 = vunpack.c.l.bf16 %v4956_v25 }
 0x2d5   :  { %2954 = vmatpush.bf16.msrb.mxu2 %v4581_v29  ;;  %v2570_v51 = vunpack.c.h.bf16 %v4958_v62  ;;  %v2571_v52 = vunpack.c.l.bf16 %v4977_v53  ;;  %v4587_v62 = vld [vmem:[#allocation13 + $0xc0] sm:$0xff] }
 0x2d6   :  { %v2536_v49 = vmul.f32 1.442695, %v2534_v40  ;;  %v2538_v55 = vmul.f32 1.442695, %v2535_v54  ;;  %4618 = vpow2.f32 %v2529_v30  ;;  %v2572_v40 = vunpack.c.h.bf16 %v4977_v53  ;;  %v4563_v54 = vld [vmem:[#allocation13] sm:$0xff]  ;;  %2969 = vmatpush.bf16.msrb.mxu3 %v4587_v62 }
 0x2d7   :  { %2930 = vmatpush.bf16.msrb.mxu0 %v4563_v54 }
 0x2d8   :  { %4620 = vpow2.f32 %v2536_v49 }
 0x2d9   :  { %4622 = vpow2.f32 %v2538_v55  ;;  %2955 = vmatpush.bf16.msrb.mxu2 %v4580_v38 }
 0x2dc   :  { %v4619_v47 = vpop.eup %4618 }
 0x2dd   :  { %2560 = vperm.xlu2 %4610, %v4619_v47   ;;  %v2543_v61 = vmul.f32 %v4619_v47, %v2542_v14  ;;  %v4579_v47 = vld [vmem:[#allocation13 + $0x80] sm:$0xff] }
 0x2de   :  { %v4621_v56 = vpop.eup %4620  ;;  %2956 = vmatpush.bf16.msrb.mxu2 %v4579_v47 }
 0x2df   :  { %v4623_v39 = vpop.eup %4622  ;;  %v2545_v43 = vsel %vm2544_vm2, %v4621_v56, 0.0  ;;  %2575 = vperm.xlu1 %4609, %v4621_v56  }
 0x2e0   :  { %v2546_v59 = vsel %vm2544_vm2, %v4623_v39, 0.0 }
 0x2e1   :  { %v2547_v32 = vadd.f32 %v2546_v59, %v2545_v43 }
 0x2e3   :  { %v2548_v60 = vrot.slane %v2547_v32, 4 }
 0x2e5   :  { %v2549_v58 = vadd.f32 %v2548_v60, %v2547_v32 }
 0x2e7   :  { %v2550_v63 = vrot.slane %v2549_v58, 2  ;;  %2580 = vperm.xlu1 %4609, %v4623_v39  }
 0x2e9   :  { %v2551_v1 = vadd.f32 %v2550_v63, %v2549_v58 }
 0x2eb   :  { %v2552_v44 = vrot.slane %v2551_v1, 1 }
 0x2ed   :  { %v2553_v10 = vadd.f32 %v2552_v44, %v2551_v1 }
 0x2ef   :  { %v2554_v2 = vadd.f32 %v2553_v10, %v2543_v61 }
 0x2f1   :  { %2556 = vst.msk [vmem:[#allocation3] sm:$0x1] %vm110_vm0, %v2554_v2 }
 0x2f8   :  { %v2644_v18 = vld [vmem:[#allocation3] sm:$0x1] }
 0x2f9   :  { %4624 = vrcp.f32 %v2644_v18 }
 0x2ff   :  { %v4625_v28 = vpop.eup %4624 }
 0x300   :  { %2648 = vperm.xlu2 %4610, %v4625_v28  }
 0x337   :  { %v2561_v12 = vpop.permute.xlu2 %2560 }
 0x338   :  { %v2563_v19 = vperm.slane %v2561_v12, 0 }
 0x33a   :  { %v2564_v26 = vmul.f32 %v2563_v19, %v2557_v21 }
 0x351   :  { %v2576_v24 = vpop.permute.xlu1 %2575 }
 0x352   :  { %v2583_v50 = vmul.f32 %v2576_v24, %v2565_v3  ;;  %v2584_v30 = vmul.f32 %v2576_v24, %v2566_v42  ;;  %v2585_v49 = vmul.f32 %v2576_v24, %v2567_v9  ;;  %v2586_v25 = vmul.f32 %v2576_v24, %v2568_v45 }
 0x359   :  { %v2581_v55 = vpop.permute.xlu1 %2580 }
 0x35a   :  { %v2587_v56 = vmul.f32 %v2581_v55, %v2569_v48  ;;  %v2588_v39 = vmul.f32 %v2581_v55, %v2570_v51  ;;  %v2589_v43 = vmul.f32 %v2581_v55, %v2571_v52  ;;  %v2590_v59 = vmul.f32 %v2581_v55, %v2572_v40  ;;  %v2649_v35 = vpop.permute.xlu2 %2648 }
 0x35b   :  { %v2651_v36 = vperm.slane %v2649_v35, 0 }
 0x35c   :  { %v2591_v32 = vadd.f32 %v2587_v56, %v2583_v50  ;;  %v2598_v60 = vadd.f32 %v2588_v39, %v2584_v30  ;;  %v2605_v58 = vadd.f32 %v2589_v43, %v2585_v49  ;;  %v2612_v53 = vadd.f32 %v2590_v59, %v2586_v25 }
 0x35e   :  { %v2592_v63 = vrot.slane %v2591_v32, 4  ;;  %v2599_v1 = vrot.slane %v2598_v60, 4  ;;  %v2606_v14 = vrot.slane %v2605_v58, 4  ;;  %v2613_v44 = vrot.slane %v2612_v53, 4 }
 0x360   :  { %v2593_v10 = vadd.f32 %v2592_v63, %v2591_v32  ;;  %v2600_v61 = vadd.f32 %v2599_v1, %v2598_v60  ;;  %v2607_v2 = vadd.f32 %v2606_v14, %v2605_v58  ;;  %v2614_v18 = vadd.f32 %v2613_v44, %v2612_v53 }
 0x362   :  { %v2594_v28 = vrot.slane %v2593_v10, 2  ;;  %v2601_v4 = vrot.slane %v2600_v61, 2  ;;  %v2608_v5 = vrot.slane %v2607_v2, 2  ;;  %v2615_v6 = vrot.slane %v2614_v18, 2 }
 0x364   :  { %v2595_v7 = vadd.f32 %v2594_v28, %v2593_v10  ;;  %v2602_v33 = vadd.f32 %v2601_v4, %v2600_v61  ;;  %v2609_v0 = vadd.f32 %v2608_v5, %v2607_v2  ;;  %v2616_v11 = vadd.f32 %v2615_v6, %v2614_v18 }
 0x366   :  { %v2596_v13 = vrot.slane %v2595_v7, 1  ;;  %v2603_v15 = vrot.slane %v2602_v33, 1  ;;  %v2610_v34 = vrot.slane %v2609_v0, 1  ;;  %v2617_v16 = vrot.slane %v2616_v11, 1 }
 0x368   :  { %v2604_v57 = vadd.f32 %v2603_v15, %v2602_v33  ;;  %v2611_v20 = vadd.f32 %v2610_v34, %v2609_v0  ;;  %v2618_v8 = vadd.f32 %v2617_v16, %v2616_v11  ;;  %v2597_v22 = vadd.f32 %v2596_v13, %v2595_v7 }
 0x36a   :  { %v2623_v23 = vrot.slane %v2604_v57, 7  ;;  %v2624_v37 = vrot.slane %v2611_v20, 6  ;;  %v2625_v24 = vrot.slane %v2618_v8, 5 }
 0x36c   :  { %v2627_v41 = vsel %vm2626_vm3, %v2597_v22, %v2623_v23  ;;  %v2629_v29 = vsel %vm2628_vm4, %v2624_v37, %v2625_v24 }
 0x36d   :  { %v2631_v31 = vsel %vm2630_vm5, %v2627_v41, %v2629_v29 }
 0x36e   :  { %v2633_v3 = vadd.f32 %v2631_v31, %v2564_v26 }
 0x370   :  { %2638 = vst.msk [vmem:[#allocation4] sm:$0xf] %vm4990_vm1, %v2633_v3 }
 0x377   :  { %v2643_v38 = vld [vmem:[#allocation4] sm:$0xf] }
 0x378   :  { %v2652_v42 = vmul.f32 %v2651_v36, %v2643_v38 }
 0x37a   :  { %v2654_v9 = vperm.slane %v2652_v42, 0  ;;  %v2655_v45 = vperm.slane %v2652_v42, 1  ;;  %v2656_v48 = vperm.slane %v2652_v42, 2  ;;  %v2657_v46 = vperm.slane %v2652_v42, 3 }
 0x37c   :  { %v2662_v50 = vpack.c.bf16 %v2654_v9, %v2654_v9  ;;  %v2663_v51 = vpack.c.bf16 %v2655_v45, %v2655_v45  ;;  %v2664_v52 = vpack.c.bf16 %v2656_v48, %v2656_v48  ;;  %v2665_v40 = vpack.c.bf16 %v2657_v46, %v2657_v46 }
 0x37e   :  { %2931 = vmatmul.bf16.vlgmr.msrb.gmra.mxu0 %v2662_v50  ;;  %2944 = vmatmul.bf16.vlgmr.msrb.gmra.mxu1 %v2663_v51 }
 0x37f   :  { %2957 = vmatmul.bf16.vlgmr.msrb.gmra.mxu2 %v2664_v52  ;;  %2970 = vmatmul.bf16.vlgmr.msrb.gmra.mxu3 %v2665_v40 }
 0x3fb   :  { %v2932_v54 = vpop.f32.mrf.mxu0  ;;  %v2945_v30 = vpop.f32.mrf.mxu1 }
 0x3fc   :  { %v2933_v49 = vadd.f32 %v2932_v54, %v2730_v27 }
 0x3fe   :  { %v2946_v25 = vadd.f32 %v2945_v30, %v2933_v49 }
 0x402   :  { %v2958_v55 = vpop.f32.mrf.mxu2  ;;  %v2971_v17 = vpop.f32.mrf.mxu3 }
 0x403   :  { %v2959_v47 = vadd.f32 %v2958_v55, %v2946_v25  ;;  %v2934_v56 = vpop.f32.mrf.mxu0  ;;  %v2947_v39 = vpop.f32.mrf.mxu1 }
 0x405   :  { %v2972_v43 = vadd.f32 %v2971_v17, %v2959_v47 }
 0x407   :  { %2975 = vst [vmem:[#allocation14] sm:$0x1] %v2972_v43 }
 0x408   :  { %2986 = dma.vmem_to_hbm [thread:$0]  %s2982_s13, 16, %s2984_s16, [#allocation7]  }
 0x40a   :  { %v2960_v59 = vpop.f32.mrf.mxu2  ;;  %v2973_v62 = vpop.f32.mrf.mxu3 }
 0x40b   :  { %4776 = dma.done.wait [#allocation7], 16  }
 0x40c   :  { %4777 = vsyncadd [#allocation7], 4294967280 }
 0x40d   :  { %2991 = vsyncpa [#allocation6], 1 }
 0x40e   :  { %2992 = vsyncpa [#allocation9], 1 }
 0x40f   :  { %2993 = vsyncpa [#allocation12], 1 }
 0x410   :  { %2994 = vsyncpa [#allocation7], 1 }

</bundles_post_ra>
